<compile_context>
chip_gen: v7x
topology: tpu7x:2x2x1
jax: 0.10.0
libtpu: 0.0.40
codegen_flags: <defaults>
</compile_context>

<pallas_src>
import functools
import math

import jax
import jax.numpy as jnp
from jax.experimental import pallas as pl
from jax.experimental.pallas import tpu as pltpu

OMEGA_0 = 10.0


def _round_up(x, m):
    return ((x + m - 1) // m) * m


def _vmem_capacity_bytes():
    try:
        return int(pltpu.get_tpu_info().vmem_capacity_bytes)
    except Exception:
        return 64 * 1024 * 1024   # conservative fallback: v7x per-TC VMEM


# -----------------------------------------------------------------------------
# Fused kernel: one batch tile through every layer; intermediate activations
# never leave VMEM/vregs.  refs = (x, w0, b0, w1, b1, ..., wL, bL, o).
# omega_0 is already folded into every (w, b).
# -----------------------------------------------------------------------------
def _siren_fused_kernel(*refs, n_mats):
    x_ref = refs[0]
    o_ref = refs[-1]
    wb = refs[1:-1]

    act_dtype = x_ref.dtype          # bf16 -> bf16 MXU fast path on v6e/v7x
    h = x_ref[...]
    for layer in range(n_mats):
        w = wb[2 * layer][...]       # (d_in, d_out), bf16
        b = wb[2 * layer + 1][...]   # (1, d_out),   f32
        y = jnp.dot(h, w, preferred_element_type=jnp.float32) + b
        if layer < n_mats - 1:
            # sine computed in f32 (v5e VPU/EUP has no bf16); cast back for the
            # next bf16 matmul.
            h = jnp.sin(y).astype(act_dtype)
        else:
            h = y                    # last SineLayer: no sin
    o_ref[...] = h.astype(o_ref.dtype)


# -----------------------------------------------------------------------------
# Wrapper: whole layer stack in ONE pallas_call; weights/biases VMEM-resident
# (constant index_map, single-buffered); batch tiled over a "parallel" grid.
# -----------------------------------------------------------------------------
def siren_forward(x, fused_params, d_output, *, tb=None):
    """x: (..., d_input).  fused_params: list of (w[in,out] bf16, b[1,out] f32)."""
    assert fused_params[-1][0].shape[1] == d_output
    orig_shape = x.shape
    d_in = orig_shape[-1]
    io_dtype = fused_params[0][0].dtype
    n_mats = len(fused_params)

    x2 = x.reshape(-1, d_in).astype(io_dtype)
    B = x2.shape[0]

    cap = _vmem_capacity_bytes()
    if tb is None:
        # Bigger batch tiles on 128 MiB parts (v5e/v6e), tighter on v7x (64 MiB).
        tb = 4096 if cap >= 96 * 1024 * 1024 else 2048

    sub = 16 if io_dtype == jnp.bfloat16 else 8   # native sublane group
    b_rounded = _round_up(B, sub)
    n_tiles = pl.cdiv(b_rounded, tb)
    if b_rounded >= 2 * sub:
        # Ensure >= 2 (even) grid steps so "parallel" can balance v7x's 2 TCs.
        n_tiles = max(n_tiles, 2)
        n_tiles += n_tiles % 2
    TB = _round_up(pl.cdiv(b_rounded, n_tiles), sub)
    B_pad = n_tiles * TB

    if B_pad != B:
        # At most one partial sublane group per tile of padded rows (their
        # bias-driven garbage is sliced off below).
        x2 = jnp.pad(x2, ((0, B_pad - B), (0, 0)))

    # Input / output stream at their natural (unpadded) widths: block last dim
    # equals the full array dim, so no 128-lane padding and no extra HBM passes.
    in_specs = [pl.BlockSpec((TB, d_in), lambda i: (i, 0))]
    flat_args = [x2]
    for (w, b) in fused_params:
        # Constant index_map -> VMEM-resident across the whole grid;
        # Buffered(1) -> no pointless double buffer for never-changing operands.
        in_specs.append(pl.BlockSpec(w.shape, lambda i: (0, 0),
                                     pipeline_mode=pl.Buffered(1)))
        in_specs.append(pl.BlockSpec(b.shape, lambda i: (0, 0),
                                     pipeline_mode=pl.Buffered(1)))
        flat_args.append(w)
        flat_args.append(b)

    kernel = functools.partial(_siren_fused_kernel, n_mats=n_mats)
    out = pl.pallas_call(
        kernel,
        out_shape=jax.ShapeDtypeStruct((B_pad, d_output), io_dtype),
        grid=(n_tiles,),
        in_specs=in_specs,
        out_specs=pl.BlockSpec((TB, d_output), lambda i: (i, 0)),
        compiler_params=pltpu.CompilerParams(
            dimension_semantics=("parallel",),       # shard batch across TCs
            vmem_limit_bytes=int(cap * 0.8),         # leave compiler headroom
        ),
    )(*flat_args)

    if B_pad != B:
        out = out[:B]
    return out.reshape(orig_shape[:-1] + (d_output,))


# -----------------------------------------------------------------------------
# Parameter init mirroring Siren.__init__ / SineLayer.init_weights (weights
# stored transposed as (in, out); bias uses PyTorch's default Linear init).
# -----------------------------------------------------------------------------
def init_siren_params(key, n_layers, d_input, d_hidden, d_neck, d_output,
                      io_dtype=jnp.bfloat16):
    assert n_layers >= 1, "n_layers >= 1 required (as in the reference net)"
    dims = [(d_input, d_hidden, True, False)]
    for i_layer in range(n_layers):
        dims.append((d_hidden, d_hidden, False, False))
        if i_layer == n_layers - 1:
            dims.append((d_hidden, d_neck, False, False))
    dims.append((d_neck, d_output, False, True))

    raw_params, fused_params = [], []
    for (din, dout, is_first, _is_last) in dims:
        key, kw, kb = jax.random.split(key, 3)
        bound_w = (1.0 / din) if is_first else (math.sqrt(6.0 / din) / OMEGA_0)
        w = jax.random.uniform(kw, (din, dout), jnp.float32,
                               minval=-bound_w, maxval=bound_w)
        bound_b = 1.0 / math.sqrt(din)     # PyTorch default Linear bias init
        b = jax.random.uniform(kb, (1, dout), jnp.float32,
                               minval=-bound_b, maxval=bound_b)
        raw_params.append((w, b))
        # Fold omega_0:  sin(omega*(xW+b)) == sin(x(omega*W) + omega*b), same
        # for the un-sined last layer.  Weights -> bf16, biases stay f32 (tiny).
        fused_params.append(((OMEGA_0 * w).astype(io_dtype),
                             (OMEGA_0 * b).astype(jnp.float32)))
    return dims, raw_params, fused_params


def siren_forward_ref_fused(x, fused_params):
    """Pure-JAX reference with the SAME numerics as the kernel (bf16 weights and
    activations, f32 accumulation / sine, bf16 output store)."""
    io_dtype = fused_params[0][0].dtype
    h = x.reshape(-1, x.shape[-1]).astype(io_dtype)
    n = len(fused_params)
    for layer, (w, b) in enumerate(fused_params):
        y = jnp.dot(h, w, preferred_element_type=jnp.float32) + b
        h = jnp.sin(y).astype(io_dtype) if layer < n - 1 else y
    out = h.astype(io_dtype).astype(jnp.float32)
    return out.reshape(x.shape[:-1] + (out.shape[-1],))


def siren_forward_ref_f32(x, dims, raw_params):
    """Full-f32 reference matching the PyTorch module numerics exactly."""
    out = x
    for (w, b), (_din, _dout, _is_first, is_last) in zip(raw_params, dims):
        y = OMEGA_0 * (out @ w + b)
        out = y if is_last else jnp.sin(y)
    return out


if __name__ == "__main__":
    key = jax.random.PRNGKey(0)

    # Small shapes consistent with the module (Linear acts on the last dim of
    # a (batch, d_input) tensor).
    n_layers, d_input, d_hidden, d_neck, d_output = 2, 4, 32, 16, 4
    batch = 8

    key, kp, kx = jax.random.split(key, 3)
    dims, raw_params, fused_params = init_siren_params(
        kp, n_layers, d_input, d_hidden, d_neck, d_output)
    x = jax.random.normal(kx, (batch, d_input), jnp.float32)

    out = siren_forward(x, fused_params, d_output)
    out = jax.block_until_ready(out)
    assert out.shape == (batch, d_output)
    out_f32 = out.astype(jnp.float32)

    # Tight check against a pure-JAX reference with identical numerics.
    ref_fused = siren_forward_ref_fused(x, fused_params)
    assert jnp.allclose(out_f32, ref_fused, atol=2e-3, rtol=2e-3), \
        "mismatch vs fused-precision reference"

    # Coarse sanity check against exact f32 module semantics (difference is
    # bf16 weight/activation quantization only).
    ref_f32 = siren_forward_ref_f32(x, dims, raw_params)
    assert float(jnp.max(jnp.abs(out_f32 - ref_f32))) < 0.5, \
        "bf16 quantization drift larger than expected"

    print("KERNEL_OK")
</pallas_src>

<mosaic_0001>
module attributes {stable_mosaic.version = 11 : i64} {
  func.func @_siren_fused_kernel(%arg0: i32, %arg1: memref<16x4xbf16, #tpu.memory_space<vmem>>, %arg2: memref<4x32xbf16, #tpu.memory_space<vmem>>, %arg3: memref<1x32xf32, #tpu.memory_space<vmem>>, %arg4: memref<32x32xbf16, #tpu.memory_space<vmem>>, %arg5: memref<1x32xf32, #tpu.memory_space<vmem>>, %arg6: memref<32x32xbf16, #tpu.memory_space<vmem>>, %arg7: memref<1x32xf32, #tpu.memory_space<vmem>>, %arg8: memref<32x16xbf16, #tpu.memory_space<vmem>>, %arg9: memref<1x16xf32, #tpu.memory_space<vmem>>, %arg10: memref<16x4xbf16, #tpu.memory_space<vmem>>, %arg11: memref<1x4xf32, #tpu.memory_space<vmem>>, %arg12: memref<16x4xbf16, #tpu.memory_space<vmem>>) attributes {dimension_semantics = [#tpu.dimension_semantics<parallel>], iteration_bounds = array<i64: 1>, scalar_prefetch = 0 : i64, scratch_operands = 0 : i64, tpu.core_type = #tpu.core_type<tc>, window_params = [{transform_indices = @transform_0, window_bounds = array<i64: 16, 4>}, {pipeline_mode = #tpu.pipeline_mode<synchronous>, transform_indices = @transform_1, window_bounds = array<i64: 4, 32>}, {pipeline_mode = #tpu.pipeline_mode<synchronous>, transform_indices = @transform_2, window_bounds = array<i64: 1, 32>}, {pipeline_mode = #tpu.pipeline_mode<synchronous>, transform_indices = @transform_3, window_bounds = array<i64: 32, 32>}, {pipeline_mode = #tpu.pipeline_mode<synchronous>, transform_indices = @transform_4, window_bounds = array<i64: 1, 32>}, {pipeline_mode = #tpu.pipeline_mode<synchronous>, transform_indices = @transform_5, window_bounds = array<i64: 32, 32>}, {pipeline_mode = #tpu.pipeline_mode<synchronous>, transform_indices = @transform_6, window_bounds = array<i64: 1, 32>}, {pipeline_mode = #tpu.pipeline_mode<synchronous>, transform_indices = @transform_7, window_bounds = array<i64: 32, 16>}, {pipeline_mode = #tpu.pipeline_mode<synchronous>, transform_indices = @transform_8, window_bounds = array<i64: 1, 16>}, {pipeline_mode = #tpu.pipeline_mode<synchronous>, transform_indices = @transform_9, window_bounds = array<i64: 16, 4>}, {pipeline_mode = #tpu.pipeline_mode<synchronous>, transform_indices = @transform_10, window_bounds = array<i64: 1, 4>}, {transform_indices = @transform_11, window_bounds = array<i64: 16, 4>}]} {
    %c0 = arith.constant 0 : index
    %c0_0 = arith.constant 0 : index
    %0 = vector.load %arg1[%c0, %c0_0] : memref<16x4xbf16, #tpu.memory_space<vmem>>, vector<16x4xbf16>
    %c0_1 = arith.constant 0 : index
    %c0_2 = arith.constant 0 : index
    %1 = vector.load %arg2[%c0_1, %c0_2] : memref<4x32xbf16, #tpu.memory_space<vmem>>, vector<4x32xbf16>
    %c0_3 = arith.constant 0 : index
    %c0_4 = arith.constant 0 : index
    %2 = vector.load %arg3[%c0_3, %c0_4] : memref<1x32xf32, #tpu.memory_space<vmem>>, vector<1x32xf32>
    %cst = arith.constant dense<0.000000e+00> : vector<16x32xf32>
    %3 = tpu.matmul %0, %1, %cst {dimension_numbers = #tpu.dot_dimension_numbers<[1], [0], [0], [1], [0, 0, 1, 1], [], []>} : vector<16x4xbf16>, vector<4x32xbf16>, vector<16x32xf32> -> vector<16x32xf32>
    %4 = vector.broadcast %2 : vector<1x32xf32> to vector<16x32xf32>
    %5 = arith.addf %3, %4 : vector<16x32xf32>
    %6 = math.sin %5 : vector<16x32xf32>
    %7 = arith.truncf %6 : vector<16x32xf32> to vector<16x32xbf16>
    %c0_5 = arith.constant 0 : index
    %c0_6 = arith.constant 0 : index
    %8 = vector.load %arg4[%c0_5, %c0_6] : memref<32x32xbf16, #tpu.memory_space<vmem>>, vector<32x32xbf16>
    %c0_7 = arith.constant 0 : index
    %c0_8 = arith.constant 0 : index
    %9 = vector.load %arg5[%c0_7, %c0_8] : memref<1x32xf32, #tpu.memory_space<vmem>>, vector<1x32xf32>
    %cst_9 = arith.constant dense<0.000000e+00> : vector<16x32xf32>
    %10 = tpu.matmul %7, %8, %cst_9 {dimension_numbers = #tpu.dot_dimension_numbers<[1], [0], [0], [1], [0, 0, 1, 1], [], []>} : vector<16x32xbf16>, vector<32x32xbf16>, vector<16x32xf32> -> vector<16x32xf32>
    %11 = vector.broadcast %9 : vector<1x32xf32> to vector<16x32xf32>
    %12 = arith.addf %10, %11 : vector<16x32xf32>
    %13 = math.sin %12 : vector<16x32xf32>
    %14 = arith.truncf %13 : vector<16x32xf32> to vector<16x32xbf16>
    %c0_10 = arith.constant 0 : index
    %c0_11 = arith.constant 0 : index
    %15 = vector.load %arg6[%c0_10, %c0_11] : memref<32x32xbf16, #tpu.memory_space<vmem>>, vector<32x32xbf16>
    %c0_12 = arith.constant 0 : index
    %c0_13 = arith.constant 0 : index
    %16 = vector.load %arg7[%c0_12, %c0_13] : memref<1x32xf32, #tpu.memory_space<vmem>>, vector<1x32xf32>
    %cst_14 = arith.constant dense<0.000000e+00> : vector<16x32xf32>
    %17 = tpu.matmul %14, %15, %cst_14 {dimension_numbers = #tpu.dot_dimension_numbers<[1], [0], [0], [1], [0, 0, 1, 1], [], []>} : vector<16x32xbf16>, vector<32x32xbf16>, vector<16x32xf32> -> vector<16x32xf32>
    %18 = vector.broadcast %16 : vector<1x32xf32> to vector<16x32xf32>
    %19 = arith.addf %17, %18 : vector<16x32xf32>
    %20 = math.sin %19 : vector<16x32xf32>
    %21 = arith.truncf %20 : vector<16x32xf32> to vector<16x32xbf16>
    %c0_15 = arith.constant 0 : index
    %c0_16 = arith.constant 0 : index
    %22 = vector.load %arg8[%c0_15, %c0_16] : memref<32x16xbf16, #tpu.memory_space<vmem>>, vector<32x16xbf16>
    %c0_17 = arith.constant 0 : index
    %c0_18 = arith.constant 0 : index
    %23 = vector.load %arg9[%c0_17, %c0_18] : memref<1x16xf32, #tpu.memory_space<vmem>>, vector<1x16xf32>
    %cst_19 = arith.constant dense<0.000000e+00> : vector<16x16xf32>
    %24 = tpu.matmul %21, %22, %cst_19 {dimension_numbers = #tpu.dot_dimension_numbers<[1], [0], [0], [1], [0, 0, 1, 1], [], []>} : vector<16x32xbf16>, vector<32x16xbf16>, vector<16x16xf32> -> vector<16x16xf32>
    %25 = vector.broadcast %23 : vector<1x16xf32> to vector<16x16xf32>
    %26 = arith.addf %24, %25 : vector<16x16xf32>
    %27 = math.sin %26 : vector<16x16xf32>
    %28 = arith.truncf %27 : vector<16x16xf32> to vector<16x16xbf16>
    %c0_20 = arith.constant 0 : index
    %c0_21 = arith.constant 0 : index
    %29 = vector.load %arg10[%c0_20, %c0_21] : memref<16x4xbf16, #tpu.memory_space<vmem>>, vector<16x4xbf16>
    %c0_22 = arith.constant 0 : index
    %c0_23 = arith.constant 0 : index
    %30 = vector.load %arg11[%c0_22, %c0_23] : memref<1x4xf32, #tpu.memory_space<vmem>>, vector<1x4xf32>
    %cst_24 = arith.constant dense<0.000000e+00> : vector<16x4xf32>
    %31 = tpu.matmul %28, %29, %cst_24 {dimension_numbers = #tpu.dot_dimension_numbers<[1], [0], [0], [1], [0, 0, 1, 1], [], []>} : vector<16x16xbf16>, vector<16x4xbf16>, vector<16x4xf32> -> vector<16x4xf32>
    %32 = vector.broadcast %30 : vector<1x4xf32> to vector<16x4xf32>
    %33 = arith.addf %31, %32 : vector<16x4xf32>
    %34 = arith.truncf %33 : vector<16x4xf32> to vector<16x4xbf16>
    %c0_25 = arith.constant 0 : index
    %c0_26 = arith.constant 0 : index
    %35 = vector.load %arg12[%c0_25, %c0_26] : memref<16x4xbf16, #tpu.memory_space<vmem>>, vector<16x4xbf16>
    tpu.vector_store %arg12[%c0_25, %c0_26], %34 {strides = array<i32>} : memref<16x4xbf16, #tpu.memory_space<vmem>>, vector<16x4xbf16>,
    return
  }
  func.func @transform_0(%arg0: i32) -> (i32, i32) {
    %c0_i32 = arith.constant 0 : i32
    %c0_i32_0 = arith.constant 0 : i32
    return %arg0, %c0_i32 : i32, i32
  }
  func.func @transform_1(%arg0: i32) -> (i32, i32) {
    %c0_i32 = arith.constant 0 : i32
    %c0_i32_0 = arith.constant 0 : i32
    %c0_i32_1 = arith.constant 0 : i32
    return %c0_i32, %c0_i32_0 : i32, i32
  }
  func.func @transform_2(%arg0: i32) -> (i32, i32) {
    %c0_i32 = arith.constant 0 : i32
    %c0_i32_0 = arith.constant 0 : i32
    %c0_i32_1 = arith.constant 0 : i32
    return %c0_i32, %c0_i32_0 : i32, i32
  }
  func.func @transform_3(%arg0: i32) -> (i32, i32) {
    %c0_i32 = arith.constant 0 : i32
    %c0_i32_0 = arith.constant 0 : i32
    %c0_i32_1 = arith.constant 0 : i32
    return %c0_i32, %c0_i32_0 : i32, i32
  }
  func.func @transform_4(%arg0: i32) -> (i32, i32) {
    %c0_i32 = arith.constant 0 : i32
    %c0_i32_0 = arith.constant 0 : i32
    %c0_i32_1 = arith.constant 0 : i32
    return %c0_i32, %c0_i32_0 : i32, i32
  }
  func.func @transform_5(%arg0: i32) -> (i32, i32) {
    %c0_i32 = arith.constant 0 : i32
    %c0_i32_0 = arith.constant 0 : i32
    %c0_i32_1 = arith.constant 0 : i32
    return %c0_i32, %c0_i32_0 : i32, i32
  }
  func.func @transform_6(%arg0: i32) -> (i32, i32) {
    %c0_i32 = arith.constant 0 : i32
    %c0_i32_0 = arith.constant 0 : i32
    %c0_i32_1 = arith.constant 0 : i32
    return %c0_i32, %c0_i32_0 : i32, i32
  }
  func.func @transform_7(%arg0: i32) -> (i32, i32) {
    %c0_i32 = arith.constant 0 : i32
    %c0_i32_0 = arith.constant 0 : i32
    %c0_i32_1 = arith.constant 0 : i32
    return %c0_i32, %c0_i32_0 : i32, i32
  }
  func.func @transform_8(%arg0: i32) -> (i32, i32) {
    %c0_i32 = arith.constant 0 : i32
    %c0_i32_0 = arith.constant 0 : i32
    %c0_i32_1 = arith.constant 0 : i32
    return %c0_i32, %c0_i32_0 : i32, i32
  }
  func.func @transform_9(%arg0: i32) -> (i32, i32) {
    %c0_i32 = arith.constant 0 : i32
    %c0_i32_0 = arith.constant 0 : i32
    %c0_i32_1 = arith.constant 0 : i32
    return %c0_i32, %c0_i32_0 : i32, i32
  }
  func.func @transform_10(%arg0: i32) -> (i32, i32) {
    %c0_i32 = arith.constant 0 : i32
    %c0_i32_0 = arith.constant 0 : i32
    %c0_i32_1 = arith.constant 0 : i32
    return %c0_i32, %c0_i32_0 : i32, i32
  }
  func.func @transform_11(%arg0: i32) -> (i32, i32) {
    %c0_i32 = arith.constant 0 : i32
    %c0_i32_0 = arith.constant 0 : i32
    return %arg0, %c0_i32 : i32, i32
  }
}

</mosaic_0001>

<bundles_post_ra>
// kernel: tpu_custom_call.1
= control target key start
LH: loop header
LB: loop body
LE: loop exit
PB: predicated region body
PF: predicated region fallthrough
CT: control target
= control target key end

     0   :  { %vm58_vm0 = vcmask 1041408   ;;  %v1399_v0 = vmov 0.0   ;;  %vm1400_vm1 = vmmov 0   ;;  %vm54_vm2 = vcmask 31744   ;;  %s1852_s1 = inlined_call_operand.vmem [shape: bf16[4,32], index: 1, kind: input, shape index: {}]   ;;  %s1853_s0 = inlined_call_operand.vmem [shape: bf16[16,4], index: 0, kind: input, shape index: {}]   ;;  %s1854_s3 = inlined_call_operand.vmem [shape: bf16[32,32], index: 3, kind: input, shape index: {}]   ;;  %s1855_s2 = inlined_call_operand.vmem [shape: f32[1,32], index: 2, kind: input, shape index: {}]   ;;  %s1856_s5 = inlined_call_operand.vmem [shape: bf16[32,32], index: 5, kind: input, shape index: {}]   ;;  %s1857_s4 = inlined_call_operand.vmem [shape: f32[1,32], index: 4, kind: input, shape index: {}]   ;;  %s1858_s7 = inlined_call_operand.vmem [shape: bf16[32,16], index: 7, kind: input, shape index: {}]   ;;  %s1859_s6 = inlined_call_operand.vmem [shape: f32[1,32], index: 6, kind: input, shape index: {}]   ;;  %s1860_s9 = inlined_call_operand.vmem [shape: bf16[16,4], index: 9, kind: input, shape index: {}]   ;;  %s1861_s8 = inlined_call_operand.vmem [shape: f32[1,16], index: 8, kind: input, shape index: {}]   ;;  %s1862_s10 = inlined_call_operand.vmem [shape: f32[1,4], index: 10, kind: input, shape index: {}]   ;;  %s1863_s11 = inlined_call_operand.vmem [shape: bf16[16,4], index: 11, kind: output, shape index: {}]  }
   0x1   :  { %1283 = vmatprep.subr.bf16.mxu0 %v1399_v0  ;;  %v41_v1 = vld [vmem:[%s1852_s1] sm:$0x3]  ;;  %1285 = vmatprep.mubr.msk.bf16.mxu0 %vm1400_vm1, %v1399_v0  ;;  %v1361_v5 = vld [vmem:[%s1854_s3 + $0x8] sm:$0xff]   ;;  %v1401_v31 = vmov 683565275  }
   0x2   :  { %v60_v2 = vsel %vm58_vm0, %v41_v1, 0  ;;  %v1359_v3 = vld [vmem:[%s1853_s0] sm:$0xff]   ;;  %1289 = vmatprep.subr.bf16.mxu1 %v1399_v0  ;;  %1293 = vmatprep.mubr.msk.bf16.mxu1 %vm1400_vm1, %v1399_v0  ;;  %v1402_v34 = vmov 2475754826   ;;  %v1403_v36 = vmov 2131351028  }
   0x3   :  { %1284 = vmatpush3.bf16.msra.mxu0 %v60_v2  ;;  %v1360_v4 = vld [vmem:[%s1854_s3] sm:$0xff]   ;;  %v1404_v38 = vmov 2102212464   ;;  %v1405_v40 = vmov 920167782  }
   0x4   :  { %1297 = vmatprep.subr.bf16.mxu0 %v1399_v0  ;;  %1290 = vmatpush3.bf16.msra.mxu1 %v1360_v4  ;;  %v1216_v6 = vld [vmem:[%s1855_s2] ss:$0 sm:$0xff]  ;;  %v1406_v47 = vmov 1326507024  }
   0x5   :  { %1291 = vmatprep.subr.bf16.mxu1 %v1399_v0 }
   0x6   :  { %1286 = vmatmul.mubr.msk.bf16.vlgmr.msra.gmra.mrb[0].mxu0 %vm54_vm2, %v1359_v3 }
   0x7   :  { %1301 = vmatprep.mubr.msk.bf16.mxu0 %vm1400_vm1, %v1399_v0 }
   0x8   :  { %1292 = vmatpush3.bf16.msra.mxu1 %v1361_v5 }
   0x9   :  { %1305 = vmatprep.subr.bf16.mxu1 %v1399_v0 }
  0xd9   :  { %v96_v7 = vpop.f32.mrb[0].mxu0 }
  0xda   :  { %v1493_v8 = vadd.f32 %v1216_v6, %v96_v7  ;;  %v1287_v9 = vpop.f32.mrb[1].mxu0 }
  0xdb   :  { %v99_v10 = vpop.f32.mrb[2].mxu0 }
  0xdc   :  { %v103_v11 = vand.u32 2147483647, %v1493_v8  ;;  %v106_v12 = vand.u32 2139095040, %v1493_v8  ;;  %v1497_v13 = vadd.f32 %v1216_v6, %v99_v10  ;;  %v1288_v14 = vpop.f32.mrb[3].mxu0 }
  0xde   :  { %v107_v15 = vshrl.u32 %v106_v12, 23  ;;  %v110_v16 = vand.u32 8388607, %v103_v11  ;;  %v210_v17 = vand.u32 2139095040, %v1497_v13  ;;  %v207_v19 = vand.u32 2147483647, %v1497_v13 }
  0xdf   :  { %vm104_vm2 = vcmp.le.f32.partialorder %v103_v11, 0.7853982 }
  0xe0   :  { %v1219_v18 = vadd.s32 4294967169, %v107_v15  ;;  %v211_v20 = vshrl.u32 %v210_v17, 23  ;;  %v111_v22 = vor.u32 8388608, %v110_v16  ;;  %v214_v24 = vand.u32 8388607, %v207_v19 }
  0xe2   :  { %v113_v21 = vadd.s32 1, %v1219_v18  ;;  %v1223_v23 = vadd.s32 4294967169, %v211_v20  ;;  %v1505_v29 = vshll.u32 %v111_v22, 8  ;;  %v215_v33 = vor.u32 8388608, %v214_v24 }
  0xe4   :  { %vm114_vm3 = vcmp.gt.s32.totalorder %v113_v21, 0  ;;  %v217_v26 = vadd.s32 1, %v1223_v23  ;;  %v255_v3 = vshll.u32 %v215_v33, 8 }
  0xe5   :  { %v115_v25 = vsel %vm114_vm3, %v113_v21, 0  ;;  %vm105_vm3 = vcmp.lt.s32.totalorder %v1493_v8, 0 }
  0xe6   :  { %v116_v27 = vshrl.u32 %v115_v25, 5  ;;  %v117_v28 = vand.u32 31, %v115_v25  ;;  %vm218_vm4 = vcmp.gt.s32.totalorder %v217_v26, 0 }
  0xe7   :  { %v219_v52 = vsel %vm218_vm4, %v217_v26, 0  ;;  %vm209_vm4 = vcmp.lt.s32.totalorder %v1497_v13, 0 }
  0xe8   :  { %v118_v30 = vsub.s32 32, %v117_v28  ;;  %v120_v32 = vshll.u32 %v1401_v31, %v117_v28  ;;  %v123_v35 = vshll.u32 %v1402_v34, %v117_v28  ;;  %v126_v37 = vshll.u32 %v1403_v36, %v117_v28 }
  0xe9   :  { %v129_v39 = vshll.u32 %v1404_v38, %v117_v28  ;;  %v132_v41 = vshll.u32 %v1405_v40, %v117_v28  ;;  %vm135_vm5 = vcmp.lt.s32.totalorder %v116_v27, 1  ;;  %vm137_vm6 = vcmp.lt.s32.totalorder %v116_v27, 3 }
  0xea   :  { %v121_v42 = vshrl.u32 %v1402_v34, %v118_v30  ;;  %v124_v43 = vshrl.u32 %v1403_v36, %v118_v30  ;;  %v127_v44 = vshrl.u32 %v1404_v38, %v118_v30  ;;  %v119_v45 = vshrl.u32 %v1401_v31, %v118_v30 }
  0xeb   :  { %v130_v46 = vshrl.u32 %v1405_v40, %v118_v30  ;;  %v133_v48 = vshrl.u32 %v1406_v47, %v118_v30  ;;  %vm138_vm7 = vcmp.lt.s32.totalorder %v116_v27, 4  ;;  %v221_v55 = vand.u32 31, %v219_v52 }
  0xec   :  { %v122_v49 = vor.u32 %v121_v42, %v120_v32  ;;  %v125_v50 = vor.u32 %v124_v43, %v123_v35  ;;  %v128_v51 = vor.u32 %v127_v44, %v126_v37  ;;  %vm136_vm8 = vcmp.lt.s32.totalorder %v116_v27, 2 }
  0xed   :  { %v131_v53 = vor.u32 %v130_v46, %v129_v39  ;;  %v134_v54 = vor.u32 %v133_v48, %v132_v41  ;;  %v222_v63 = vsub.s32 32, %v221_v55  ;;  %v220_v7 = vshrl.u32 %v219_v52, 5 }
  0xee   :  { %v139_v56 = vsel %vm135_vm5, %v119_v45, %v122_v49  ;;  %v140_v57 = vsel %vm138_vm7, %v128_v51, 2102212464  ;;  %v143_v58 = vsel %vm135_vm5, %v122_v49, %v125_v50  ;;  %v147_v59 = vsel %vm135_vm5, %v125_v50, %v128_v51 }
  0xef   :  { %v141_v60 = vsel %vm137_vm6, %v125_v50, %v140_v57  ;;  %v144_v61 = vsel %vm138_vm7, %v131_v53, 920167782  ;;  %v148_v62 = vsel %vm138_vm7, %v134_v54, 1326507024  ;;  %v224_v15 = vshll.u32 %v1401_v31, %v221_v55 }
  0xf0   :  { %v145_v1 = vsel %vm137_vm6, %v128_v51, %v144_v61  ;;  %v149_v2 = vsel %vm137_vm6, %v131_v53, %v148_v62  ;;  %v142_v4 = vsel %vm136_vm8, %v139_v56, %v141_v60  ;;  %v225_v16 = vshrl.u32 %v1402_v34, %v222_v63 }
  0xf1   :  { %v146_v5 = vsel %vm136_vm8, %v143_v58, %v145_v1  ;;  %v150_v6 = vsel %vm136_vm8, %v147_v59, %v149_v2  ;;  %v227_v17 = vshll.u32 %v1402_v34, %v221_v55  ;;  %v228_v18 = vshrl.u32 %v1403_v36, %v222_v63 }
  0xf2   :  { %v1526_v9 = vmul.u32.u64.low %v1505_v29, %v150_v6  ;;  %v1527_v10 = vmul.u32.u64.high %v1505_v29, %v150_v6, %v1526_v9  ;;  %v1530_v12 = vmul.u32.u64.low %v1505_v29, %v146_v5  ;;  %v1531_v14 = vmul.u32.u64.high %v1505_v29, %v146_v5, %v1530_v12 }
  0xf3   :  { %v230_v20 = vshll.u32 %v1403_v36, %v221_v55  ;;  %v231_v21 = vshrl.u32 %v1404_v38, %v222_v63  ;;  %v233_v22 = vshll.u32 %v1404_v38, %v221_v55  ;;  %v234_v23 = vshrl.u32 %v1405_v40, %v222_v63 }
  0xf4   :  { %v226_v24 = vor.u32 %v225_v16, %v224_v15  ;;  %v229_v25 = vor.u32 %v228_v18, %v227_v17  ;;  %v236_v26 = vshll.u32 %v1405_v40, %v221_v55  ;;  %v237_v27 = vshrl.u32 %v1406_v47, %v222_v63 }
  0xf5   :  { %v158_v28 = vmul.u32 %v1505_v29, %v142_v4  ;;  %vm160_vm9 = vc.u32 %v1527_v10, %v1530_v12  ;;  %v161_v30 = vadd.s32 1, %v1531_v14  ;;  %v232_v32 = vor.u32 %v231_v21, %v230_v20 }
  0xf6   :  { %v223_v33 = vshrl.u32 %v1401_v31, %v222_v63  ;;  %v235_v35 = vor.u32 %v234_v23, %v233_v22  ;;  %v238_v37 = vor.u32 %v237_v27, %v236_v26  ;;  %vm239_vm10 = vcmp.lt.s32.totalorder %v220_v7, 1 }
  0xf7   :  { %v162_v39 = vsel %vm160_vm9, %v161_v30, %v1531_v14  ;;  %vm241_vm11 = vcmp.lt.s32.totalorder %v220_v7, 3  ;;  %vm242_vm12 = vcmp.lt.s32.totalorder %v220_v7, 4  ;;  %v247_v41 = vsel %vm239_vm10, %v226_v24, %v229_v25 }
  0xf8   :  { %v163_v42 = vadd.s32 %v162_v39, %v158_v28  ;;  %v244_v43 = vsel %vm242_vm12, %v232_v32, 2102212464  ;;  %v248_v44 = vsel %vm242_vm12, %v235_v35, 920167782  ;;  %v251_v29 = vsel %vm239_vm10, %v229_v25, %v232_v32 }
  0xf9   :  { %vm240_vm13 = vcmp.lt.s32.totalorder %v220_v7, 2  ;;  %v243_v45 = vsel %vm239_vm10, %v223_v33, %v226_v24  ;;  %v249_v46 = vsel %vm241_vm11, %v232_v32, %v248_v44  ;;  %v252_v48 = vsel %vm242_vm12, %v238_v37, 1326507024 }
  0xfa   :  { %v164_v49 = vadd.s32 536870912, %v163_v42  ;;  %v245_v50 = vsel %vm241_vm11, %v229_v25, %v244_v43  ;;  %v250_v51 = vsel %vm240_vm13, %v247_v41, %v249_v46  ;;  %v253_v52 = vsel %vm241_vm11, %v235_v35, %v252_v48 }
  0xfb   :  { %v254_v53 = vsel %vm240_vm13, %v251_v29, %v253_v52  ;;  %v1550_v54 = vmul.u32.u64.low %v255_v3, %v250_v51  ;;  %v1551_v55 = vmul.u32.u64.high %v255_v3, %v250_v51, %v1550_v54  ;;  %v246_v59 = vsel %vm240_vm13, %v243_v45, %v245_v50 }
  0xfc   :  { %v165_v56 = vshrl.u32 %v164_v49, 30  ;;  %v1553_v57 = vmul.u32.u64.low %v255_v3, %v254_v53  ;;  %v1554_v58 = vmul.u32.u64.high %v255_v3, %v254_v53, %v1553_v57  ;;  %v262_v63 = vmul.u32 %v255_v3, %v246_v59 }
  0xfd   :  { %v265_v61 = vadd.s32 1, %v1551_v55  ;;  %v159_v18 = vadd.s32 %v1530_v12, %v1527_v10  ;;  %vm208_vm5 = vcmp.le.f32.partialorder %v207_v19, 0.7853982  ;;  %vm195_vm9 = vweird.f32 %v1493_v8 }
  0xfe   :  { %v166_v60 = vshll.u32 %v165_v56, 30  ;;  %vm264_vm14 = vc.u32 %v1554_v58, %v1550_v54  ;;  %v189_v37 = vsub.s32 4, %v165_v56  ;;  %v263_v10 = vadd.s32 %v1550_v54, %v1554_v58 }
  0xff   :  { %v266_v1 = vsel %vm264_vm14, %v265_v61, %v1551_v55  ;;  %vm299_vm13 = vweird.f32 %v1497_v13  ;;  %vm335_vm14 = vcmask 261120  }
 0x100   :  { %v167_v62 = vsub.s32 %v163_v42, %v166_v60  ;;  %v267_v4 = vadd.s32 %v266_v1, %v262_v63  ;;  %v190_v48 = vsel %vm105_vm3, %v189_v37, %v165_v56 }
 0x101   :  { %v192_v53 = vsel %vm104_vm2, 0, %v190_v48 }
 0x102   :  { %v169_v2 = vsub.s32 0, %v167_v62  ;;  %v268_v6 = vadd.s32 536870912, %v267_v4  ;;  %v196_v57 = vadd.s32 3, %v192_v53 }
 0x104   :  { %v1220_v5 = vmin.u32 %v169_v2, %v167_v62  ;;  %v269_v9 = vshrl.u32 %v268_v6, 30  ;;  %v197_v61 = vand.u32 3, %v196_v57 }
 0x106   :  { %v171_v7 = vclz %v1220_v5  ;;  %v270_v15 = vshll.u32 %v269_v9, 30  ;;  %v293_v59 = vsub.s32 4, %v269_v9  ;;  %vm202_vm6 = vcmp.eq.s32.totalorder %v197_v61, 2 }
 0x107   :  { %vm199_vm7 = vcmp.eq.s32.totalorder %v197_v61, 0  ;;  %vm198_vm8 = vcmp.lt.s32.totalorder %v197_v61, 2 }
 0x108   :  { %v1221_v14 = vadd.s32 4294967294, %v171_v7  ;;  %v271_v16 = vsub.s32 %v267_v4, %v270_v15  ;;  %v294_v56 = vsel %vm209_vm4, %v293_v59, %v269_v9 }
 0x109   :  { %v296_v2 = vsel %vm208_vm5, 0, %v294_v56 }
 0x10a   :  { %vm1222_vm15 = vcmp.lt.s32.totalorder %v1221_v14, 0  ;;  %v273_v21 = vsub.s32 0, %v271_v16  ;;  %v300_v7 = vadd.s32 3, %v296_v2 }
 0x10b   :  { %v174_v17 = vsel %vm1222_vm15, 0, %v1221_v14 }
 0x10c   :  { %v175_v20 = vsub.s32 32, %v174_v17  ;;  %v179_v3 = vsub.s32 4294967266, %v174_v17  ;;  %v176_v22 = vshll.u32 %v167_v62, %v174_v17  ;;  %v1224_v25 = vmin.u32 %v273_v21, %v271_v16 }
 0x10d   :  { %v301_v15 = vand.u32 3, %v300_v7 }
 0x10e   :  { %v177_v23 = vshrl.u32 %v159_v18, %v175_v20  ;;  %v180_v24 = vadd.s32 127, %v179_v3  ;;  %v275_v28 = vclz %v1224_v25  ;;  %v1363_v25 = vld [vmem:[%s1856_s5 + $0x8] sm:$0xff]  }
 0x10f   :  { %vm306_vm10 = vcmp.eq.s32.totalorder %v301_v15, 2  ;;  %vm303_vm11 = vcmp.eq.s32.totalorder %v301_v15, 0  ;;  %vm302_vm12 = vcmp.lt.s32.totalorder %v301_v15, 2 }
 0x110   :  { %v178_v26 = vor.u32 %v177_v23, %v176_v22  ;;  %v181_v27 = vshll.u32 %v180_v24, 23  ;;  %v1225_v32 = vadd.s32 4294967294, %v275_v28 }
 0x112   :  { %v182_v30 = vor.u32 4788187, %v181_v27  ;;  %v185_v35 = vcvt.s32.f32 %v178_v26  ;;  %vm1226_vm0 = vcmp.lt.s32.totalorder %v1225_v32, 0 }
 0x113   :  { %v278_v39 = vsel %vm1226_vm0, 0, %v1225_v32 }
 0x114   :  { %v183_v33 = vand.u32 2147483647, %v182_v30  ;;  %v279_v12 = vsub.s32 32, %v278_v39  ;;  %v283_v42 = vsub.s32 4294967266, %v278_v39  ;;  %v280_v44 = vshll.u32 %v271_v16, %v278_v39 }
 0x116   :  { %v186_v41 = vmul.f32 %v185_v35, %v183_v33  ;;  %v281_v29 = vshrl.u32 %v263_v10, %v279_v12  ;;  %v284_v45 = vadd.s32 127, %v283_v42 }
 0x118   :  { %v187_v43 = vxor.u32 2147483648, %v186_v41  ;;  %v282_v49 = vor.u32 %v281_v29, %v280_v44  ;;  %v285_v50 = vshll.u32 %v284_v45, 23 }
 0x11a   :  { %v188_v46 = vsel %vm105_vm3, %v187_v43, %v186_v41  ;;  %v286_v52 = vor.u32 4788187, %v285_v50  ;;  %v289_v55 = vcvt.s32.f32 %v282_v49 }
 0x11b   :  { %v191_v51 = vsel %vm104_vm2, %v1493_v8, %v188_v46  ;;  %v1362_v8 = vld [vmem:[%s1856_s5] sm:$0xff]  }
 0x11c   :  { %1367 = vcosq.f32 %v191_v51  ;;  %v287_v54 = vand.u32 2147483647, %v286_v52  ;;  %1298 = vmatpush3.bf16.msra.mxu0 %v1362_v8 }
 0x11d   :  { %1369 = vsinq.f32 %v191_v51  ;;  %1299 = vmatprep.subr.bf16.mxu0 %v1399_v0 }
 0x11e   :  { %v290_v58 = vmul.f32 %v289_v55, %v287_v54 }
 0x120   :  { %v291_v60 = vxor.u32 2147483648, %v290_v58  ;;  %1300 = vmatpush3.bf16.msra.mxu0 %v1363_v25 }
 0x121   :  { %1313 = vmatprep.subr.bf16.mxu0 %v1399_v0 }
 0x122   :  { %v292_v11 = vsel %vm209_vm4, %v291_v60, %v290_v58 }
 0x123   :  { %v295_v62 = vsel %vm208_vm5, %v1497_v13, %v292_v11  ;;  %v1227_v13 = vld [vmem:[%s1857_s4] ss:$0 sm:$0xff] }
 0x124   :  { %1371 = vcosq.f32 %v295_v62 }
 0x125   :  { %1373 = vsinq.f32 %v295_v62 }
 0x126   :  { %v1368_v63 = vpop.eup %1367 }
 0x127   :  { %v1370_v1 = vpop.eup %1369  ;;  %v203_v4 = vxor.u32 2147483648, %v1368_v63 }
 0x128   :  { %v200_v5 = vxor.u32 2147483648, %v1370_v1 }
 0x129   :  { %v204_v6 = vsel %vm202_vm6, %v203_v4, %v1370_v1 }
 0x12a   :  { %v201_v14 = vsel %vm199_vm7, %v1368_v63, %v200_v5 }
 0x12b   :  { %v205_v19 = vsel %vm198_vm8, %v201_v14, %v204_v6 }
 0x12c   :  { %v206_v9 = vsel %vm195_vm9, nan, %v205_v19 }
 0x12e   :  { %v1372_v16 = vpop.eup %1371 }
 0x12f   :  { %v1374_v17 = vpop.eup %1373  ;;  %v307_v18 = vxor.u32 2147483648, %v1372_v16 }
 0x130   :  { %v304_v20 = vxor.u32 2147483648, %v1374_v17 }
 0x131   :  { %v308_v3 = vsel %vm306_vm10, %v307_v18, %v1374_v17 }
 0x132   :  { %v305_v21 = vsel %vm303_vm11, %v1372_v16, %v304_v20 }
 0x133   :  { %v309_v22 = vsel %vm302_vm12, %v305_v21, %v308_v3 }
 0x134   :  { %v310_v23 = vsel %vm299_vm13, nan, %v309_v22 }
 0x135   :  { %v311_v24 = vpack.c.bf16 %v310_v23, %v206_v9 }
 0x137   :  { %1294 = vmatmul.mubr.msk.bf16.vlgmr.msra.gmra.mrb[0].mxu1 %vm335_vm14, %v311_v24 }
 0x138   :  { %1309 = vmatprep.mubr.msk.bf16.mxu1 %vm1400_vm1, %v1399_v0 }
 0x20a   :  { %v373_v26 = vpop.f32.mrb[0].mxu1 }
 0x20b   :  { %v1586_v27 = vadd.f32 %v1227_v13, %v373_v26  ;;  %v1295_v28 = vpop.f32.mrb[1].mxu1 }
 0x20c   :  { %v376_v30 = vpop.f32.mrb[2].mxu1 }
 0x20d   :  { %v380_v32 = vand.u32 2147483647, %v1586_v27  ;;  %v383_v33 = vand.u32 2139095040, %v1586_v27  ;;  %v1296_v35 = vpop.f32.mrb[3].mxu1  ;;  %v1590_v37 = vadd.f32 %v1227_v13, %v376_v30 }
 0x20f   :  { %v384_v39 = vshrl.u32 %v383_v33, 23  ;;  %v387_v41 = vand.u32 8388607, %v380_v32  ;;  %v487_v10 = vand.u32 2139095040, %v1590_v37  ;;  %v484_v42 = vand.u32 2147483647, %v1590_v37 }
 0x211   :  { %v1231_v12 = vadd.s32 4294967169, %v384_v39  ;;  %v488_v43 = vshrl.u32 %v487_v10, 23  ;;  %v388_v29 = vor.u32 8388608, %v387_v41  ;;  %v491_v46 = vand.u32 8388607, %v484_v42 }
 0x213   :  { %v390_v44 = vadd.s32 1, %v1231_v12  ;;  %v1235_v45 = vadd.s32 4294967169, %v488_v43  ;;  %v1598_v52 = vshll.u32 %v388_v29, 8  ;;  %v492_v55 = vor.u32 8388608, %v491_v46 }
 0x215   :  { %vm391_vm15 = vcmp.gt.s32.totalorder %v390_v44, 0  ;;  %v494_v49 = vadd.s32 1, %v1235_v45  ;;  %v532_v24 = vshll.u32 %v492_v55, 8 }
 0x216   :  { %v392_v48 = vsel %vm391_vm15, %v390_v44, 0  ;;  %vm381_vm15 = vcmp.le.f32.partialorder %v380_v32, 0.7853982 }
 0x217   :  { %v393_v50 = vshrl.u32 %v392_v48, 5  ;;  %v394_v51 = vand.u32 31, %v392_v48  ;;  %vm495_vm0 = vcmp.gt.s32.totalorder %v494_v49, 0 }
 0x218   :  { %v496_v6 = vsel %vm495_vm0, %v494_v49, 0  ;;  %vm382_vm0 = vcmp.lt.s32.totalorder %v1586_v27, 0 }
 0x219   :  { %v395_v53 = vsub.s32 32, %v394_v51  ;;  %v397_v54 = vshll.u32 %v1401_v31, %v394_v51  ;;  %v400_v57 = vshll.u32 %v1402_v34, %v394_v51  ;;  %v403_v58 = vshll.u32 %v1403_v36, %v394_v51 }
 0x21a   :  { %v406_v59 = vshll.u32 %v1404_v38, %v394_v51  ;;  %v409_v60 = vshll.u32 %v1405_v40, %v394_v51  ;;  %vm412_vm2 = vcmp.lt.s32.totalorder %v393_v50, 1  ;;  %vm414_vm3 = vcmp.lt.s32.totalorder %v393_v50, 3 }
 0x21b   :  { %v398_v11 = vshrl.u32 %v1402_v34, %v395_v53  ;;  %v401_v56 = vshrl.u32 %v1403_v36, %v395_v53  ;;  %v404_v61 = vshrl.u32 %v1404_v38, %v395_v53  ;;  %v396_v62 = vshrl.u32 %v1401_v31, %v395_v53 }
 0x21c   :  { %v407_v63 = vshrl.u32 %v1405_v40, %v395_v53  ;;  %v410_v1 = vshrl.u32 %v1406_v47, %v395_v53  ;;  %vm415_vm4 = vcmp.lt.s32.totalorder %v393_v50, 4  ;;  %v498_v19 = vand.u32 31, %v496_v6 }
 0x21d   :  { %v399_v2 = vor.u32 %v398_v11, %v397_v54  ;;  %v402_v4 = vor.u32 %v401_v56, %v400_v57  ;;  %v405_v5 = vor.u32 %v404_v61, %v403_v58  ;;  %vm413_vm5 = vcmp.lt.s32.totalorder %v393_v50, 2 }
 0x21e   :  { %v408_v7 = vor.u32 %v407_v63, %v406_v59  ;;  %v411_v14 = vor.u32 %v410_v1, %v409_v60  ;;  %v499_v21 = vsub.s32 32, %v498_v19  ;;  %v497_v26 = vshrl.u32 %v496_v6, 5 }
 0x21f   :  { %v416_v9 = vsel %vm412_vm2, %v396_v62, %v399_v2  ;;  %v417_v15 = vsel %vm415_vm4, %v405_v5, 2102212464  ;;  %v420_v16 = vsel %vm412_vm2, %v399_v2, %v402_v4  ;;  %v424_v17 = vsel %vm412_vm2, %v402_v4, %v405_v5 }
 0x220   :  { %v418_v18 = vsel %vm414_vm3, %v402_v4, %v417_v15  ;;  %v421_v20 = vsel %vm415_vm4, %v408_v7, 920167782  ;;  %v425_v3 = vsel %vm415_vm4, %v411_v14, 1326507024  ;;  %v501_v39 = vshll.u32 %v1401_v31, %v498_v19 }
 0x221   :  { %v422_v22 = vsel %vm414_vm3, %v405_v5, %v421_v20  ;;  %v426_v23 = vsel %vm414_vm3, %v408_v7, %v425_v3  ;;  %v419_v8 = vsel %vm413_vm5, %v416_v9, %v418_v18  ;;  %v502_v41 = vshrl.u32 %v1402_v34, %v499_v21 }
 0x222   :  { %v423_v25 = vsel %vm413_vm5, %v420_v16, %v422_v22  ;;  %v427_v13 = vsel %vm413_vm5, %v424_v17, %v426_v23  ;;  %v504_v10 = vshll.u32 %v1402_v34, %v498_v19  ;;  %v505_v12 = vshrl.u32 %v1403_v36, %v499_v21 }
 0x223   :  { %v1619_v28 = vmul.u32.u64.low %v1598_v52, %v427_v13  ;;  %v1620_v30 = vmul.u32.u64.high %v1598_v52, %v427_v13, %v1619_v28  ;;  %v1623_v33 = vmul.u32.u64.low %v1598_v52, %v423_v25  ;;  %v1624_v35 = vmul.u32.u64.high %v1598_v52, %v423_v25, %v1623_v33 }
 0x224   :  { %v507_v43 = vshll.u32 %v1403_v36, %v498_v19  ;;  %v508_v44 = vshrl.u32 %v1404_v38, %v499_v21  ;;  %v510_v29 = vshll.u32 %v1404_v38, %v498_v19  ;;  %v511_v45 = vshrl.u32 %v1405_v40, %v499_v21 }
 0x225   :  { %v503_v46 = vor.u32 %v502_v41, %v501_v39  ;;  %v506_v48 = vor.u32 %v505_v12, %v504_v10  ;;  %v513_v49 = vshll.u32 %v1405_v40, %v498_v19  ;;  %v514_v50 = vshrl.u32 %v1406_v47, %v499_v21 }
 0x226   :  { %v435_v51 = vmul.u32 %v1598_v52, %v419_v8  ;;  %vm437_vm6 = vc.u32 %v1620_v30, %v1623_v33  ;;  %v438_v53 = vadd.s32 1, %v1624_v35  ;;  %v509_v54 = vor.u32 %v508_v44, %v507_v43 }
 0x227   :  { %v500_v55 = vshrl.u32 %v1401_v31, %v499_v21  ;;  %v512_v57 = vor.u32 %v511_v45, %v510_v29  ;;  %v515_v58 = vor.u32 %v514_v50, %v513_v49  ;;  %vm516_vm7 = vcmp.lt.s32.totalorder %v497_v26, 1 }
 0x228   :  { %v439_v59 = vsel %vm437_vm6, %v438_v53, %v1624_v35  ;;  %vm518_vm8 = vcmp.lt.s32.totalorder %v497_v26, 3  ;;  %vm519_vm9 = vcmp.lt.s32.totalorder %v497_v26, 4  ;;  %v524_v60 = vsel %vm516_vm7, %v503_v46, %v506_v48 }
 0x229   :  { %v440_v11 = vadd.s32 %v439_v59, %v435_v51  ;;  %v521_v56 = vsel %vm519_vm9, %v509_v54, 2102212464  ;;  %v525_v61 = vsel %vm519_vm9, %v512_v57, 920167782  ;;  %v528_v52 = vsel %vm516_vm7, %v506_v48, %v509_v54 }
 0x22a   :  { %vm517_vm10 = vcmp.lt.s32.totalorder %v497_v26, 2  ;;  %v520_v62 = vsel %vm516_vm7, %v500_v55, %v503_v46  ;;  %v526_v63 = vsel %vm518_vm8, %v509_v54, %v525_v61  ;;  %v529_v1 = vsel %vm519_vm9, %v515_v58, 1326507024 }
 0x22b   :  { %v441_v2 = vadd.s32 536870912, %v440_v11  ;;  %v522_v4 = vsel %vm518_vm8, %v506_v48, %v521_v56  ;;  %v527_v5 = vsel %vm517_vm10, %v524_v60, %v526_v63  ;;  %v530_v6 = vsel %vm518_vm8, %v512_v57, %v529_v1 }
 0x22c   :  { %v531_v7 = vsel %vm517_vm10, %v528_v52, %v530_v6  ;;  %v1643_v14 = vmul.u32.u64.low %v532_v24, %v527_v5  ;;  %v1644_v19 = vmul.u32.u64.high %v532_v24, %v527_v5, %v1643_v14  ;;  %v523_v17 = vsel %vm517_vm10, %v520_v62, %v522_v4 }
 0x22d   :  { %v442_v9 = vshrl.u32 %v441_v2, 30  ;;  %v1646_v15 = vmul.u32.u64.low %v532_v24, %v531_v7  ;;  %v1647_v16 = vmul.u32.u64.high %v532_v24, %v531_v7, %v1646_v15  ;;  %v539_v21 = vmul.u32 %v532_v24, %v523_v17 }
 0x22e   :  { %v542_v20 = vadd.s32 1, %v1644_v19  ;;  %v436_v12 = vadd.s32 %v1623_v33, %v1620_v30  ;;  %vm486_vm2 = vcmp.lt.s32.totalorder %v1590_v37, 0  ;;  %vm485_vm3 = vcmp.le.f32.partialorder %v484_v42, 0.7853982 }
 0x22f   :  { %v443_v18 = vshll.u32 %v442_v9, 30  ;;  %vm541_vm11 = vc.u32 %v1647_v16, %v1643_v14  ;;  %v466_v58 = vsub.s32 4, %v442_v9  ;;  %v540_v30 = vadd.s32 %v1643_v14, %v1647_v16 }
 0x230   :  { %v543_v22 = vsel %vm541_vm11, %v542_v20, %v1644_v19  ;;  %vm472_vm7 = vweird.f32 %v1586_v27  ;;  %vm576_vm11 = vweird.f32 %v1590_v37 }
 0x231   :  { %v444_v3 = vsub.s32 %v440_v11, %v443_v18  ;;  %v544_v8 = vadd.s32 %v543_v22, %v539_v21  ;;  %v467_v1 = vsel %vm382_vm0, %v466_v58, %v442_v9 }
 0x232   :  { %v469_v7 = vsel %vm381_vm15, 0, %v467_v1 }
 0x233   :  { %v446_v23 = vsub.s32 0, %v444_v3  ;;  %v545_v13 = vadd.s32 536870912, %v544_v8  ;;  %v473_v15 = vadd.s32 3, %v469_v7 }
 0x235   :  { %v1232_v25 = vmin.u32 %v446_v23, %v444_v3  ;;  %v546_v28 = vshrl.u32 %v545_v13, 30  ;;  %v474_v32 = vand.u32 3, %v473_v15 }
 0x237   :  { %v448_v26 = vclz %v1232_v25  ;;  %v547_v39 = vshll.u32 %v546_v28, 30  ;;  %v570_v17 = vsub.s32 4, %v546_v28  ;;  %vm479_vm4 = vcmp.eq.s32.totalorder %v474_v32, 2 }
 0x238   :  { %vm476_vm5 = vcmp.eq.s32.totalorder %v474_v32, 0  ;;  %vm475_vm6 = vcmp.lt.s32.totalorder %v474_v32, 2 }
 0x239   :  { %v1233_v35 = vadd.s32 4294967294, %v448_v26  ;;  %v548_v41 = vsub.s32 %v544_v8, %v547_v39  ;;  %v571_v20 = vsel %vm486_vm2, %v570_v17, %v546_v28 }
 0x23a   :  { %v573_v23 = vsel %vm485_vm3, 0, %v571_v20 }
 0x23b   :  { %vm1234_vm12 = vcmp.lt.s32.totalorder %v1233_v35, 0  ;;  %v550_v44 = vsub.s32 0, %v548_v41  ;;  %v577_v26 = vadd.s32 3, %v573_v23 }
 0x23c   :  { %v451_v10 = vsel %vm1234_vm12, 0, %v1233_v35 }
 0x23d   :  { %v452_v43 = vsub.s32 32, %v451_v10  ;;  %v456_v24 = vsub.s32 4294967266, %v451_v10  ;;  %v453_v29 = vshll.u32 %v444_v3, %v451_v10  ;;  %v1236_v48 = vmin.u32 %v550_v44, %v548_v41 }
 0x23e   :  { %v578_v28 = vand.u32 3, %v577_v26 }
 0x23f   :  { %v454_v45 = vshrl.u32 %v436_v12, %v452_v43  ;;  %v457_v46 = vadd.s32 127, %v456_v24  ;;  %v552_v51 = vclz %v1236_v48  ;;  %v1365_v48 = vld [vmem:[%s1858_s7 + $0x8] sm:$0xff]  }
 0x240   :  { %vm583_vm8 = vcmp.eq.s32.totalorder %v578_v28, 2  ;;  %vm580_vm9 = vcmp.eq.s32.totalorder %v578_v28, 0  ;;  %vm579_vm10 = vcmp.lt.s32.totalorder %v578_v28, 2 }
 0x241   :  { %v455_v49 = vor.u32 %v454_v45, %v453_v29  ;;  %v458_v50 = vshll.u32 %v457_v46, 23  ;;  %v1237_v54 = vadd.s32 4294967294, %v552_v51 }
 0x243   :  { %v459_v53 = vor.u32 4788187, %v458_v50  ;;  %v462_v57 = vcvt.s32.f32 %v455_v49  ;;  %vm1238_vm13 = vcmp.lt.s32.totalorder %v1237_v54, 0 }
 0x244   :  { %v555_v59 = vsel %vm1238_vm13, 0, %v1237_v54 }
 0x245   :  { %v460_v55 = vand.u32 2147483647, %v459_v53  ;;  %v556_v33 = vsub.s32 32, %v555_v59  ;;  %v560_v11 = vsub.s32 4294967266, %v555_v59  ;;  %v557_v61 = vshll.u32 %v548_v41, %v555_v59 }
 0x247   :  { %v463_v60 = vmul.f32 %v462_v57, %v460_v55  ;;  %v558_v52 = vshrl.u32 %v540_v30, %v556_v33  ;;  %v561_v62 = vadd.s32 127, %v560_v11 }
 0x249   :  { %v464_v56 = vxor.u32 2147483648, %v463_v60  ;;  %v559_v2 = vor.u32 %v558_v52, %v557_v61  ;;  %v562_v4 = vshll.u32 %v561_v62, 23 }
 0x24b   :  { %v465_v63 = vsel %vm382_vm0, %v464_v56, %v463_v60  ;;  %v563_v6 = vor.u32 4788187, %v562_v4  ;;  %v566_v19 = vcvt.s32.f32 %v559_v2 }
 0x24c   :  { %v468_v5 = vsel %vm381_vm15, %v1586_v27, %v465_v63  ;;  %v1364_v27 = vld [vmem:[%s1858_s7] sm:$0xff]  }
 0x24d   :  { %1375 = vcosq.f32 %v468_v5  ;;  %v564_v14 = vand.u32 2147483647, %v563_v6  ;;  %1306 = vmatpush3.bf16.msra.mxu1 %v1364_v27 }
 0x24e   :  { %1377 = vsinq.f32 %v468_v5  ;;  %1307 = vmatprep.subr.bf16.mxu1 %v1399_v0 }
 0x24f   :  { %v567_v16 = vmul.f32 %v566_v19, %v564_v14 }
 0x251   :  { %v568_v18 = vxor.u32 2147483648, %v567_v16  ;;  %1308 = vmatpush3.bf16.msra.mxu1 %v1365_v48 }
 0x253   :  { %v569_v9 = vsel %vm486_vm2, %v568_v18, %v567_v16 }
 0x254   :  { %v572_v3 = vsel %vm485_vm3, %v1590_v37, %v569_v9  ;;  %v1239_v37 = vld [vmem:[%s1859_s6] ss:$0 sm:$0xff] }
 0x255   :  { %1379 = vcosq.f32 %v572_v3 }
 0x256   :  { %1381 = vsinq.f32 %v572_v3 }
 0x257   :  { %v1376_v21 = vpop.eup %1375 }
 0x258   :  { %v1378_v22 = vpop.eup %1377  ;;  %v480_v8 = vxor.u32 2147483648, %v1376_v21 }
 0x259   :  { %v477_v25 = vxor.u32 2147483648, %v1378_v22 }
 0x25a   :  { %v481_v13 = vsel %vm479_vm4, %v480_v8, %v1378_v22 }
 0x25b   :  { %v478_v35 = vsel %vm476_vm5, %v1376_v21, %v477_v25 }
 0x25c   :  { %v482_v42 = vsel %vm475_vm6, %v478_v35, %v481_v13 }
 0x25d   :  { %v483_v39 = vsel %vm472_vm7, nan, %v482_v42 }
 0x25f   :  { %v1380_v41 = vpop.eup %1379 }
 0x260   :  { %v1382_v10 = vpop.eup %1381  ;;  %v584_v12 = vxor.u32 2147483648, %v1380_v41 }
 0x261   :  { %v581_v43 = vxor.u32 2147483648, %v1382_v10 }
 0x262   :  { %v585_v24 = vsel %vm583_vm8, %v584_v12, %v1382_v10 }
 0x263   :  { %v582_v44 = vsel %vm580_vm9, %v1380_v41, %v581_v43 }
 0x264   :  { %v586_v29 = vsel %vm579_vm10, %v582_v44, %v585_v24 }
 0x265   :  { %v587_v45 = vsel %vm576_vm11, nan, %v586_v29 }
 0x266   :  { %v588_v46 = vpack.c.bf16 %v587_v45, %v483_v39 }
 0x268   :  { %1302 = vmatmul.mubr.msk.bf16.vlgmr.msra.gmra.mrb[4].mxu0 %vm335_vm14, %v588_v46 }
 0x269   :  { %1315 = vmatprep.mubr.msk.bf16.mxu0 %vm1400_vm1, %v1399_v0 }
 0x33b   :  { %v649_v49 = vpop.f32.mrb[4].mxu0 }
 0x33c   :  { %v1678_v50 = vadd.f32 %v1239_v37, %v649_v49  ;;  %v1303_v51 = vpop.f32.mrb[5].mxu0 }
 0x33d   :  { %v652_v53 = vpop.f32.mrb[6].mxu0 }
 0x33e   :  { %v656_v54 = vand.u32 2147483647, %v1678_v50  ;;  %v659_v55 = vand.u32 2139095040, %v1678_v50  ;;  %v1304_v57 = vpop.f32.mrb[7].mxu0  ;;  %v1682_v58 = vadd.f32 %v1239_v37, %v652_v53 }
 0x340   :  { %v660_v59 = vshrl.u32 %v659_v55, 23  ;;  %v663_v0 = vand.u32 8388607, %v656_v54  ;;  %v763_v60 = vand.u32 2139095040, %v1682_v58  ;;  %v760_v33 = vand.u32 2147483647, %v1682_v58 }
 0x341   :  { %vm657_vm11 = vcmp.le.f32.partialorder %v656_v54, 0.7853982 }
 0x342   :  { %v1243_v30 = vadd.s32 4294967169, %v660_v59  ;;  %v764_v11 = vshrl.u32 %v763_v60, 23  ;;  %v664_v61 = vor.u32 8388608, %v663_v0  ;;  %v767_v62 = vand.u32 8388607, %v760_v33 }
 0x344   :  { %v666_v56 = vadd.s32 1, %v1243_v30  ;;  %v1247_v52 = vadd.s32 4294967169, %v764_v11  ;;  %v1690_v5 = vshll.u32 %v664_v61, 8  ;;  %v768_v14 = vor.u32 8388608, %v767_v62 }
 0x346   :  { %vm667_vm1 = vcmp.gt.s32.totalorder %v666_v56, 0  ;;  %v770_v1 = vadd.s32 1, %v1247_v52  ;;  %v808_v45 = vshll.u32 %v768_v14, 8 }
 0x347   :  { %v668_v63 = vsel %vm667_vm1, %v666_v56, 0  ;;  %vm658_vm1 = vcmp.lt.s32.totalorder %v1678_v50, 0 }
 0x348   :  { %v669_v2 = vshrl.u32 %v668_v63, 5  ;;  %v670_v4 = vand.u32 31, %v668_v63  ;;  %vm771_vm12 = vcmp.gt.s32.totalorder %v770_v1, 0 }
 0x349   :  { %v772_v25 = vsel %vm771_vm12, %v770_v1, 0  ;;  %vm762_vm12 = vcmp.lt.s32.totalorder %v1682_v58, 0 }
 0x34a   :  { %v671_v6 = vsub.s32 32, %v670_v4  ;;  %v673_v7 = vshll.u32 %v1401_v31, %v670_v4  ;;  %v676_v19 = vshll.u32 %v1402_v34, %v670_v4  ;;  %v679_v15 = vshll.u32 %v1403_v36, %v670_v4 }
 0x34b   :  { %v682_v16 = vshll.u32 %v1404_v38, %v670_v4  ;;  %v685_v17 = vshll.u32 %v1405_v40, %v670_v4  ;;  %vm688_vm13 = vcmp.lt.s32.totalorder %v669_v2, 1  ;;  %vm690_vm15 = vcmp.lt.s32.totalorder %v669_v2, 3 }
 0x34c   :  { %v674_v18 = vshrl.u32 %v1402_v34, %v671_v6  ;;  %v677_v32 = vshrl.u32 %v1403_v36, %v671_v6  ;;  %v680_v9 = vshrl.u32 %v1404_v38, %v671_v6  ;;  %v672_v20 = vshrl.u32 %v1401_v31, %v671_v6 }
 0x34d   :  { %v683_v3 = vshrl.u32 %v1405_v40, %v671_v6  ;;  %v686_v21 = vshrl.u32 %v1406_v47, %v671_v6  ;;  %vm691_vm0 = vcmp.lt.s32.totalorder %v669_v2, 4  ;;  %v774_v35 = vand.u32 31, %v772_v25 }
 0x34e   :  { %v675_v22 = vor.u32 %v674_v18, %v673_v7  ;;  %v678_v23 = vor.u32 %v677_v32, %v676_v19  ;;  %v681_v8 = vor.u32 %v680_v9, %v679_v15  ;;  %vm689_vm2 = vcmp.lt.s32.totalorder %v669_v2, 2 }
 0x34f   :  { %v684_v13 = vor.u32 %v683_v3, %v682_v16  ;;  %v687_v26 = vor.u32 %v686_v21, %v685_v17  ;;  %v775_v24 = vsub.s32 32, %v774_v35  ;;  %v773_v37 = vshrl.u32 %v772_v25, 5 }
 0x350   :  { %v692_v42 = vsel %vm688_vm13, %v672_v20, %v675_v22  ;;  %v693_v39 = vsel %vm691_vm0, %v681_v8, 2102212464  ;;  %v696_v28 = vsel %vm688_vm13, %v675_v22, %v678_v23  ;;  %v700_v41 = vsel %vm688_vm13, %v678_v23, %v681_v8 }
 0x351   :  { %v694_v10 = vsel %vm690_vm15, %v678_v23, %v693_v39  ;;  %v697_v12 = vsel %vm691_vm0, %v684_v13, 920167782  ;;  %v701_v43 = vsel %vm691_vm0, %v687_v26, 1326507024  ;;  %v777_v57 = vshll.u32 %v1401_v31, %v774_v35 }
 0x352   :  { %v698_v44 = vsel %vm690_vm15, %v681_v8, %v697_v12  ;;  %v702_v29 = vsel %vm690_vm15, %v684_v13, %v701_v43  ;;  %v695_v46 = vsel %vm689_vm2, %v692_v42, %v694_v10  ;;  %v778_v59 = vshrl.u32 %v1402_v34, %v775_v24 }
 0x353   :  { %v699_v27 = vsel %vm689_vm2, %v696_v28, %v698_v44  ;;  %v703_v48 = vsel %vm689_vm2, %v700_v41, %v702_v29  ;;  %v780_v0 = vshll.u32 %v1402_v34, %v774_v35  ;;  %v781_v60 = vshrl.u32 %v1403_v36, %v775_v24 }
 0x354   :  { %v1711_v49 = vmul.u32.u64.low %v1690_v5, %v703_v48  ;;  %v1712_v51 = vmul.u32.u64.high %v1690_v5, %v703_v48, %v1711_v49  ;;  %v1715_v53 = vmul.u32.u64.low %v1690_v5, %v699_v27  ;;  %v1716_v55 = vmul.u32.u64.high %v1690_v5, %v699_v27, %v1715_v53 }
 0x355   :  { %v783_v30 = vshll.u32 %v1403_v36, %v774_v35  ;;  %v784_v11 = vshrl.u32 %v1404_v38, %v775_v24  ;;  %v786_v56 = vshll.u32 %v1404_v38, %v774_v35  ;;  %v787_v61 = vshrl.u32 %v1405_v40, %v775_v24 }
 0x356   :  { %v779_v52 = vor.u32 %v778_v59, %v777_v57  ;;  %v782_v62 = vor.u32 %v781_v60, %v780_v0  ;;  %v789_v63 = vshll.u32 %v1405_v40, %v774_v35  ;;  %v790_v1 = vshrl.u32 %v1406_v47, %v775_v24 }
 0x357   :  { %v711_v2 = vmul.u32 %v1690_v5, %v695_v46  ;;  %vm713_vm3 = vc.u32 %v1712_v51, %v1715_v53  ;;  %v714_v4 = vadd.s32 1, %v1716_v55  ;;  %v785_v6 = vor.u32 %v784_v11, %v783_v30 }
 0x358   :  { %v776_v7 = vshrl.u32 %v1401_v31, %v775_v24  ;;  %v788_v14 = vor.u32 %v787_v61, %v786_v56  ;;  %v791_v19 = vor.u32 %v790_v1, %v789_v63  ;;  %vm792_vm4 = vcmp.lt.s32.totalorder %v773_v37, 1 }
 0x359   :  { %v715_v15 = vsel %vm713_vm3, %v714_v4, %v1716_v55  ;;  %vm794_vm5 = vcmp.lt.s32.totalorder %v773_v37, 3  ;;  %vm795_vm6 = vcmp.lt.s32.totalorder %v773_v37, 4  ;;  %v800_v16 = vsel %vm792_vm4, %v779_v52, %v782_v62 }
 0x35a   :  { %v716_v17 = vadd.s32 %v715_v15, %v711_v2  ;;  %v797_v18 = vsel %vm795_vm6, %v785_v6, 2102212464  ;;  %v801_v32 = vsel %vm795_vm6, %v788_v14, 920167782  ;;  %v804_v5 = vsel %vm792_vm4, %v782_v62, %v785_v6 }
 0x35b   :  { %vm793_vm7 = vcmp.lt.s32.totalorder %v773_v37, 2  ;;  %v796_v9 = vsel %vm792_vm4, %v776_v7, %v779_v52  ;;  %v802_v20 = vsel %vm794_vm5, %v785_v6, %v801_v32  ;;  %v805_v3 = vsel %vm795_vm6, %v791_v19, 1326507024 }
 0x35c   :  { %v717_v21 = vadd.s32 536870912, %v716_v17  ;;  %v798_v22 = vsel %vm794_vm5, %v782_v62, %v797_v18  ;;  %v803_v23 = vsel %vm793_vm7, %v800_v16, %v802_v20  ;;  %v806_v8 = vsel %vm794_vm5, %v788_v14, %v805_v3 }
 0x35d   :  { %v807_v25 = vsel %vm793_vm7, %v804_v5, %v806_v8  ;;  %v1735_v13 = vmul.u32.u64.low %v808_v45, %v803_v23  ;;  %v1736_v26 = vmul.u32.u64.high %v808_v45, %v803_v23, %v1735_v13  ;;  %v799_v28 = vsel %vm793_vm7, %v796_v9, %v798_v22 }
 0x35e   :  { %v718_v35 = vshrl.u32 %v717_v21, 30  ;;  %v1738_v42 = vmul.u32.u64.low %v808_v45, %v807_v25  ;;  %v1739_v39 = vmul.u32.u64.high %v808_v45, %v807_v25, %v1738_v42  ;;  %v815_v43 = vmul.u32 %v808_v45, %v799_v28 }
 0x35f   :  { %v818_v10 = vadd.s32 1, %v1736_v26  ;;  %v712_v0 = vadd.s32 %v1715_v53, %v1712_v51  ;;  %vm761_vm13 = vcmp.le.f32.partialorder %v760_v33, 0.7853982  ;;  %vm748_vm3 = vweird.f32 %v1678_v50 }
 0x360   :  { %v719_v41 = vshll.u32 %v718_v35, 30  ;;  %vm817_vm8 = vc.u32 %v1739_v39, %v1735_v13  ;;  %v742_v14 = vsub.s32 4, %v718_v35  ;;  %v816_v51 = vadd.s32 %v1735_v13, %v1739_v39 }
 0x361   :  { %v819_v24 = vsel %vm817_vm8, %v818_v10, %v1736_v26  ;;  %vm852_vm7 = vweird.f32 %v1682_v58 }
 0x362   :  { %v720_v12 = vsub.s32 %v716_v17, %v719_v41  ;;  %v820_v29 = vadd.s32 %v819_v24, %v815_v43  ;;  %v743_v20 = vsel %vm658_vm1, %v742_v14, %v718_v35 }
 0x363   :  { %v745_v8 = vsel %vm657_vm11, 0, %v743_v20 }
 0x364   :  { %v722_v44 = vsub.s32 0, %v720_v12  ;;  %v821_v27 = vadd.s32 536870912, %v820_v29  ;;  %v749_v26 = vadd.s32 3, %v745_v8 }
 0x366   :  { %v1244_v46 = vmin.u32 %v722_v44, %v720_v12  ;;  %v822_v37 = vshrl.u32 %v821_v27, 30  ;;  %v750_v54 = vand.u32 3, %v749_v26 }
 0x368   :  { %v724_v48 = vclz %v1244_v46  ;;  %v823_v55 = vshll.u32 %v822_v37, 30  ;;  %v846_v39 = vsub.s32 4, %v822_v37  ;;  %vm755_vm15 = vcmp.eq.s32.totalorder %v750_v54, 2 }
 0x369   :  { %vm752_vm0 = vcmp.eq.s32.totalorder %v750_v54, 0  ;;  %vm751_vm2 = vcmp.lt.s32.totalorder %v750_v54, 2 }
 0x36a   :  { %v1245_v49 = vadd.s32 4294967294, %v724_v48  ;;  %v824_v57 = vsub.s32 %v820_v29, %v823_v55  ;;  %v847_v41 = vsel %vm762_vm12, %v846_v39, %v822_v37 }
 0x36b   :  { %v849_v24 = vsel %vm761_vm13, 0, %v847_v41 }
 0x36c   :  { %vm1246_vm9 = vcmp.lt.s32.totalorder %v1245_v49, 0  ;;  %v826_v30 = vsub.s32 0, %v824_v57  ;;  %v853_v27 = vadd.s32 3, %v849_v24 }
 0x36d   :  { %v727_v59 = vsel %vm1246_vm9, 0, %v1245_v49 }
 0x36e   :  { %v728_v60 = vsub.s32 32, %v727_v59  ;;  %v732_v45 = vsub.s32 4294967266, %v727_v59  ;;  %v729_v11 = vshll.u32 %v720_v12, %v727_v59  ;;  %v1248_v52 = vmin.u32 %v826_v30, %v824_v57 }
 0x36f   :  { %v854_v37 = vand.u32 3, %v853_v27 }
 0x370   :  { %v730_v56 = vshrl.u32 %v712_v0, %v728_v60  ;;  %v733_v61 = vadd.s32 127, %v732_v45  ;;  %v828_v1 = vclz %v1248_v52 }
 0x371   :  { %vm859_vm4 = vcmp.eq.s32.totalorder %v854_v37, 2  ;;  %vm856_vm5 = vcmp.eq.s32.totalorder %v854_v37, 0  ;;  %vm855_vm6 = vcmp.lt.s32.totalorder %v854_v37, 2 }
 0x372   :  { %v731_v62 = vor.u32 %v730_v56, %v729_v11  ;;  %v734_v63 = vshll.u32 %v733_v61, 23  ;;  %v1249_v4 = vadd.s32 4294967294, %v828_v1  ;;  %v1251_v61 = vld [vmem:[%s1861_s8] ss:$0 sm:$0xff] }
 0x374   :  { %v735_v2 = vor.u32 4788187, %v734_v63  ;;  %v738_v7 = vcvt.s32.f32 %v731_v62  ;;  %vm1250_vm10 = vcmp.lt.s32.totalorder %v1249_v4, 0 }
 0x375   :  { %v831_v19 = vsel %vm1250_vm10, 0, %v1249_v4 }
 0x376   :  { %v736_v6 = vand.u32 2147483647, %v735_v2  ;;  %v832_v53 = vsub.s32 32, %v831_v19  ;;  %v836_v16 = vsub.s32 4294967266, %v831_v19  ;;  %v833_v18 = vshll.u32 %v824_v57, %v831_v19 }
 0x378   :  { %v739_v15 = vmul.f32 %v738_v7, %v736_v6  ;;  %v834_v32 = vshrl.u32 %v816_v51, %v832_v53  ;;  %v837_v5 = vadd.s32 127, %v836_v16 }
 0x37a   :  { %v740_v17 = vxor.u32 2147483648, %v739_v15  ;;  %v835_v3 = vor.u32 %v834_v32, %v833_v18  ;;  %v838_v21 = vshll.u32 %v837_v5, 23 }
 0x37c   :  { %v741_v9 = vsel %vm658_vm1, %v740_v17, %v739_v15  ;;  %v839_v23 = vor.u32 4788187, %v838_v21  ;;  %v842_v13 = vcvt.s32.f32 %v835_v3 }
 0x37d   :  { %v744_v22 = vsel %vm657_vm11, %v1678_v50, %v741_v9  ;;  %v1366_v50 = vld [vmem:[%s1860_s9] sm:$0xff]  }
 0x37e   :  { %1383 = vcosq.f32 %v744_v22  ;;  %v840_v25 = vand.u32 2147483647, %v839_v23  ;;  %1314 = vmatpush3.bf16.msra.mxu0 %v1366_v50 }
 0x37f   :  { %1385 = vsinq.f32 %v744_v22 }
 0x380   :  { %v843_v42 = vmul.f32 %v842_v13, %v840_v25 }
 0x382   :  { %v844_v28 = vxor.u32 2147483648, %v843_v42 }
 0x384   :  { %v845_v35 = vsel %vm762_vm12, %v844_v28, %v843_v42 }
 0x385   :  { %v848_v10 = vsel %vm761_vm13, %v1682_v58, %v845_v35 }
 0x386   :  { %1387 = vcosq.f32 %v848_v10 }
 0x387   :  { %1389 = vsinq.f32 %v848_v10 }
 0x388   :  { %v1384_v12 = vpop.eup %1383 }
 0x389   :  { %v1386_v43 = vpop.eup %1385  ;;  %v756_v44 = vxor.u32 2147483648, %v1384_v12 }
 0x38a   :  { %v753_v29 = vxor.u32 2147483648, %v1386_v43 }
 0x38b   :  { %v757_v46 = vsel %vm755_vm15, %v756_v44, %v1386_v43 }
 0x38c   :  { %v754_v48 = vsel %vm752_vm0, %v1384_v12, %v753_v29 }
 0x38d   :  { %v758_v33 = vsel %vm751_vm2, %v754_v48, %v757_v46 }
 0x38e   :  { %v759_v49 = vsel %vm748_vm3, nan, %v758_v33 }
 0x390   :  { %v1388_v55 = vpop.eup %1387 }
 0x391   :  { %v1390_v57 = vpop.eup %1389  ;;  %v860_v59 = vxor.u32 2147483648, %v1388_v55 }
 0x392   :  { %v857_v0 = vxor.u32 2147483648, %v1390_v57 }
 0x393   :  { %v861_v60 = vsel %vm859_vm4, %v860_v59, %v1390_v57 }
 0x394   :  { %v858_v45 = vsel %vm856_vm5, %v1388_v55, %v857_v0 }
 0x395   :  { %v862_v30 = vsel %vm855_vm6, %v858_v45, %v861_v60 }
 0x396   :  { %v863_v11 = vsel %vm852_vm7, nan, %v862_v30 }
 0x397   :  { %v864_v56 = vpack.c.bf16 %v863_v11, %v759_v49 }
 0x399   :  { %1310 = vmatmul.mubr.msk.bf16.vlgmr.msra.gmra.mrb[4].mxu1 %vm335_vm14, %v864_v56 }
 0x46c   :  { %v925_v52 = vpop.f32.mrb[4].mxu1 }
 0x46d   :  { %v1764_v62 = vadd.f32 %v1251_v61, %v925_v52  ;;  %v1311_v63 = vpop.f32.mrb[5].mxu1 }
 0x46e   :  { %v928_v1 = vpop.f32.mrb[6].mxu1 }
 0x46f   :  { %v932_v58 = vand.u32 2147483647, %v1764_v62  ;;  %v935_v2 = vand.u32 2139095040, %v1764_v62  ;;  %v1312_v4 = vpop.f32.mrb[7].mxu1  ;;  %v1768_v6 = vadd.f32 %v1251_v61, %v928_v1  ;;  %vm934_vm7 = vcmp.lt.s32.totalorder %v1764_v62, 0 }
 0x471   :  { %v936_v7 = vshrl.u32 %v935_v2, 23  ;;  %v939_v14 = vand.u32 8388607, %v932_v58  ;;  %v1039_v19 = vand.u32 2139095040, %v1768_v6  ;;  %v1036_v51 = vand.u32 2147483647, %v1768_v6 }
 0x472   :  { %vm933_vm6 = vcmp.le.f32.partialorder %v932_v58, 0.7853982 }
 0x473   :  { %v1255_v15 = vadd.s32 4294967169, %v936_v7  ;;  %v1040_v53 = vshrl.u32 %v1039_v19, 23  ;;  %v940_v17 = vor.u32 8388608, %v939_v14  ;;  %v1043_v32 = vand.u32 8388607, %v1036_v51 }
 0x475   :  { %v942_v16 = vadd.s32 1, %v1255_v15  ;;  %v1259_v18 = vadd.s32 4294967169, %v1040_v53  ;;  %v1776_v21 = vshll.u32 %v940_v17, 8  ;;  %v1044_v8 = vor.u32 8388608, %v1043_v32 }
 0x477   :  { %vm943_vm14 = vcmp.gt.s32.totalorder %v942_v16, 0  ;;  %v1046_v9 = vadd.s32 1, %v1259_v18  ;;  %v1084_v30 = vshll.u32 %v1044_v8, 8 }
 0x478   :  { %v944_v5 = vsel %vm943_vm14, %v942_v16, 0  ;;  %vm1038_vm14 = vcmp.lt.s32.totalorder %v1768_v6, 0 }
 0x479   :  { %v945_v20 = vshrl.u32 %v944_v5, 5  ;;  %v946_v3 = vand.u32 31, %v944_v5  ;;  %vm1047_vm8 = vcmp.gt.s32.totalorder %v1046_v9, 0 }
 0x47a   :  { %v1048_v44 = vsel %vm1047_vm8, %v1046_v9, 0  ;;  %vm1037_vm8 = vcmp.le.f32.partialorder %v1036_v51, 0.7853982 }
 0x47b   :  { %v947_v22 = vsub.s32 32, %v946_v3  ;;  %v949_v23 = vshll.u32 %v1401_v31, %v946_v3  ;;  %v952_v25 = vshll.u32 %v1402_v34, %v946_v3  ;;  %v955_v13 = vshll.u32 %v1403_v36, %v946_v3 }
 0x47c   :  { %v958_v26 = vshll.u32 %v1404_v38, %v946_v3  ;;  %v961_v42 = vshll.u32 %v1405_v40, %v946_v3  ;;  %vm964_vm9 = vcmp.lt.s32.totalorder %v945_v20, 1  ;;  %vm966_vm10 = vcmp.lt.s32.totalorder %v945_v20, 3 }
 0x47d   :  { %v950_v39 = vshrl.u32 %v1402_v34, %v947_v22  ;;  %v953_v28 = vshrl.u32 %v1403_v36, %v947_v22  ;;  %v956_v54 = vshrl.u32 %v1404_v38, %v947_v22  ;;  %v948_v35 = vshrl.u32 %v1401_v31, %v947_v22 }
 0x47e   :  { %v959_v41 = vshrl.u32 %v1405_v40, %v947_v22  ;;  %v962_v10 = vshrl.u32 %v1406_v47, %v947_v22  ;;  %vm967_vm11 = vcmp.lt.s32.totalorder %v945_v20, 4  ;;  %v1050_v27 = vand.u32 31, %v1048_v44 }
 0x47f   :  { %v951_v12 = vor.u32 %v950_v39, %v949_v23  ;;  %v954_v43 = vor.u32 %v953_v28, %v952_v25  ;;  %v957_v24 = vor.u32 %v956_v54, %v955_v13  ;;  %vm965_vm1 = vcmp.lt.s32.totalorder %v945_v20, 2 }
 0x480   :  { %v960_v29 = vor.u32 %v959_v41, %v958_v26  ;;  %v963_v46 = vor.u32 %v962_v10, %v961_v42  ;;  %v1051_v0 = vsub.s32 32, %v1050_v27  ;;  %v1049_v61 = vshrl.u32 %v1048_v44, 5 }
 0x481   :  { %v968_v48 = vsel %vm964_vm9, %v948_v35, %v951_v12  ;;  %v969_v33 = vsel %vm967_vm11, %v957_v24, 2102212464  ;;  %v972_v49 = vsel %vm964_vm9, %v951_v12, %v954_v43  ;;  %v976_v37 = vsel %vm964_vm9, %v954_v43, %v957_v24 }
 0x482   :  { %v970_v55 = vsel %vm966_vm10, %v954_v43, %v969_v33  ;;  %v973_v57 = vsel %vm967_vm11, %v960_v29, 920167782  ;;  %v977_v59 = vsel %vm967_vm11, %v963_v46, 1326507024  ;;  %v1053_v4 = vshll.u32 %v1401_v31, %v1050_v27 }
 0x483   :  { %v974_v60 = vsel %vm966_vm10, %v957_v24, %v973_v57  ;;  %v978_v45 = vsel %vm966_vm10, %v960_v29, %v977_v59  ;;  %v971_v11 = vsel %vm965_vm1, %v968_v48, %v970_v55  ;;  %v1054_v7 = vshrl.u32 %v1402_v34, %v1051_v0 }
 0x484   :  { %v975_v56 = vsel %vm965_vm1, %v972_v49, %v974_v60  ;;  %v979_v50 = vsel %vm965_vm1, %v976_v37, %v978_v45  ;;  %v1056_v14 = vshll.u32 %v1402_v34, %v1050_v27  ;;  %v1057_v19 = vshrl.u32 %v1403_v36, %v1051_v0 }
 0x485   :  { %v1797_v52 = vmul.u32.u64.low %v1776_v21, %v979_v50  ;;  %v1798_v63 = vmul.u32.u64.high %v1776_v21, %v979_v50, %v1797_v52  ;;  %v1801_v1 = vmul.u32.u64.low %v1776_v21, %v975_v56  ;;  %v1802_v2 = vmul.u32.u64.high %v1776_v21, %v975_v56, %v1801_v1 }
 0x486   :  { %v1059_v15 = vshll.u32 %v1403_v36, %v1050_v27  ;;  %v1060_v53 = vshrl.u32 %v1404_v38, %v1051_v0  ;;  %v1062_v16 = vshll.u32 %v1404_v38, %v1050_v27  ;;  %v1063_v17 = vshrl.u32 %v1405_v40, %v1051_v0 }
 0x487   :  { %v1055_v18 = vor.u32 %v1054_v7, %v1053_v4  ;;  %v1058_v32 = vor.u32 %v1057_v19, %v1056_v14  ;;  %v1065_v5 = vshll.u32 %v1405_v40, %v1050_v27  ;;  %v1066_v9 = vshrl.u32 %v1406_v47, %v1051_v0 }
 0x488   :  { %v987_v20 = vmul.u32 %v1776_v21, %v971_v11  ;;  %vm989_vm12 = vc.u32 %v1798_v63, %v1801_v1  ;;  %v990_v34 = vadd.s32 1, %v1802_v2  ;;  %v1061_v36 = vor.u32 %v1060_v53, %v1059_v15 }
 0x489   :  { %v1052_v3 = vshrl.u32 %v1401_v31, %v1051_v0  ;;  %v1064_v22 = vor.u32 %v1063_v17, %v1062_v16  ;;  %v1067_v38 = vor.u32 %v1066_v9, %v1065_v5  ;;  %vm1068_vm13 = vcmp.lt.s32.totalorder %v1049_v61, 1 }
 0x48a   :  { %v991_v23 = vsel %vm989_vm12, %v990_v34, %v1802_v2  ;;  %vm1070_vm15 = vcmp.lt.s32.totalorder %v1049_v61, 3  ;;  %vm1071_vm0 = vcmp.lt.s32.totalorder %v1049_v61, 4  ;;  %v1076_v40 = vsel %vm1068_vm13, %v1055_v18, %v1058_v32 }
 0x48b   :  { %v992_v8 = vadd.s32 %v991_v23, %v987_v20  ;;  %v1073_v47 = vsel %vm1071_vm0, %v1061_v36, 2102212464  ;;  %v1077_v25 = vsel %vm1071_vm0, %v1064_v22, 920167782  ;;  %v1080_v21 = vsel %vm1068_vm13, %v1058_v32, %v1061_v36 }
 0x48c   :  { %vm1069_vm2 = vcmp.lt.s32.totalorder %v1049_v61, 2  ;;  %v1072_v13 = vsel %vm1068_vm13, %v1052_v3, %v1055_v18  ;;  %v1078_v26 = vsel %vm1070_vm15, %v1061_v36, %v1077_v25  ;;  %v1081_v42 = vsel %vm1071_vm0, %v1067_v38, 1326507024 }
 0x48d   :  { %v993_v39 = vadd.s32 536870912, %v992_v8  ;;  %v1074_v28 = vsel %vm1070_vm15, %v1058_v32, %v1073_v47  ;;  %v1079_v54 = vsel %vm1069_vm2, %v1076_v40, %v1078_v26  ;;  %v1082_v31 = vsel %vm1070_vm15, %v1064_v22, %v1081_v42 }
 0x48e   :  { %v1083_v35 = vsel %vm1069_vm2, %v1080_v21, %v1082_v31  ;;  %v1821_v41 = vmul.u32.u64.low %v1084_v30, %v1079_v54  ;;  %v1822_v10 = vmul.u32.u64.high %v1084_v30, %v1079_v54, %v1821_v41  ;;  %v1075_v44 = vsel %vm1069_vm2, %v1072_v13, %v1074_v28 }
 0x48f   :  { %v994_v12 = vshrl.u32 %v993_v39, 30  ;;  %v1824_v43 = vmul.u32.u64.low %v1084_v30, %v1083_v35  ;;  %v1825_v24 = vmul.u32.u64.high %v1084_v30, %v1083_v35, %v1824_v43  ;;  %v1091_v48 = vmul.u32 %v1084_v30, %v1075_v44 }
 0x490   :  { %v1094_v46 = vadd.s32 1, %v1822_v10  ;;  %v988_v50 = vadd.s32 %v1801_v1, %v1798_v63  ;;  %vm1024_vm1 = vweird.f32 %v1764_v62  ;;  %vm1128_vm0 = vweird.f32 %v1768_v6 }
 0x491   :  { %v995_v29 = vshll.u32 %v994_v12, 30  ;;  %vm1093_vm3 = vc.u32 %v1825_v24, %v1821_v41  ;;  %v1018_v5 = vsub.s32 4, %v994_v12  ;;  %v1092_v63 = vadd.s32 %v1821_v41, %v1825_v24 }
 0x492   :  { %v1095_v33 = vsel %vm1093_vm3, %v1094_v46, %v1822_v10  ;;  %vm1156_vm2 = vcmask 130048   ;;  %vm1209_vm3 = vcmask 27648  }
 0x493   :  { %v996_v27 = vsub.s32 %v992_v8, %v995_v29  ;;  %v1096_v37 = vadd.s32 %v1095_v33, %v1091_v48  ;;  %v1019_v40 = vsel %vm934_vm7, %v1018_v5, %v994_v12 }
 0x494   :  { %v1021_v13 = vsel %vm933_vm6, 0, %v1019_v40 }
 0x495   :  { %v998_v49 = vsub.s32 0, %v996_v27  ;;  %v1097_v57 = vadd.s32 536870912, %v1096_v37  ;;  %v1025_v39 = vadd.s32 3, %v1021_v13 }
 0x497   :  { %v1256_v55 = vmin.u32 %v998_v49, %v996_v27  ;;  %v1098_v0 = vshrl.u32 %v1097_v57, 30  ;;  %v1026_v58 = vand.u32 3, %v1025_v39 }
 0x499   :  { %v1000_v59 = vclz %v1256_v55  ;;  %v1099_v45 = vshll.u32 %v1098_v0, 30  ;;  %v1122_v54 = vsub.s32 4, %v1098_v0  ;;  %vm1031_vm9 = vcmp.eq.s32.totalorder %v1026_v58, 2 }
 0x49a   :  { %vm1028_vm10 = vcmp.eq.s32.totalorder %v1026_v58, 0  ;;  %vm1027_vm11 = vcmp.lt.s32.totalorder %v1026_v58, 2 }
 0x49b   :  { %v1257_v60 = vadd.s32 4294967294, %v1000_v59  ;;  %v1100_v11 = vsub.s32 %v1096_v37, %v1099_v45  ;;  %v1123_v41 = vsel %vm1038_vm14, %v1122_v54, %v1098_v0 }
 0x49c   :  { %v1125_v24 = vsel %vm1037_vm8, 0, %v1123_v41 }
 0x49d   :  { %vm1258_vm4 = vcmp.lt.s32.totalorder %v1257_v60, 0  ;;  %v1102_v52 = vsub.s32 0, %v1100_v11 }
 0x49e   :  { %v1003_v56 = vsel %vm1258_vm4, 0, %v1257_v60 }
 0x49f   :  { %v1004_v61 = vsub.s32 32, %v1003_v56  ;;  %v1008_v30 = vsub.s32 4294967266, %v1003_v56  ;;  %v1005_v2 = vshll.u32 %v996_v27, %v1003_v56  ;;  %v1260_v14 = vmin.u32 %v1102_v52, %v1100_v11 }
 0x4a0   :  { %v1129_v27 = vadd.s32 3, %v1125_v24 }
 0x4a1   :  { %v1006_v4 = vshrl.u32 %v988_v50, %v1004_v61  ;;  %v1009_v7 = vadd.s32 127, %v1008_v30  ;;  %v1104_v53 = vclz %v1260_v14 }
 0x4a2   :  { %v1130_v49 = vand.u32 3, %v1129_v27 }
 0x4a3   :  { %v1007_v19 = vor.u32 %v1006_v4, %v1005_v2  ;;  %v1010_v15 = vshll.u32 %v1009_v7, 23  ;;  %v1261_v17 = vadd.s32 4294967294, %v1104_v53 }
 0x4a4   :  { %vm1135_vm12 = vcmp.eq.s32.totalorder %v1130_v49, 2  ;;  %vm1132_vm13 = vcmp.eq.s32.totalorder %v1130_v49, 0  ;;  %vm1131_vm15 = vcmp.lt.s32.totalorder %v1130_v49, 2 }
 0x4a5   :  { %v1011_v16 = vor.u32 4788187, %v1010_v15  ;;  %v1014_v32 = vcvt.s32.f32 %v1007_v19  ;;  %vm1262_vm5 = vcmp.lt.s32.totalorder %v1261_v17, 0 }
 0x4a6   :  { %v1107_v9 = vsel %vm1262_vm5, 0, %v1261_v17 }
 0x4a7   :  { %v1012_v18 = vand.u32 2147483647, %v1011_v16  ;;  %v1108_v1 = vsub.s32 32, %v1107_v9  ;;  %v1112_v34 = vsub.s32 4294967266, %v1107_v9  ;;  %v1109_v3 = vshll.u32 %v1100_v11, %v1107_v9 }
 0x4a9   :  { %v1015_v20 = vmul.f32 %v1014_v32, %v1012_v18  ;;  %v1110_v22 = vshrl.u32 %v1092_v63, %v1108_v1  ;;  %v1113_v38 = vadd.s32 127, %v1112_v34 }
 0x4ab   :  { %v1016_v36 = vxor.u32 2147483648, %v1015_v20  ;;  %v1111_v8 = vor.u32 %v1110_v22, %v1109_v3  ;;  %v1114_v47 = vshll.u32 %v1113_v38, 23 }
 0x4ad   :  { %v1017_v23 = vsel %vm934_vm7, %v1016_v36, %v1015_v20  ;;  %v1115_v21 = vor.u32 4788187, %v1114_v47  ;;  %v1118_v42 = vcvt.s32.f32 %v1111_v8 }
 0x4ae   :  { %v1020_v25 = vsel %vm933_vm6, %v1764_v62, %v1017_v23  ;;  %v1263_v62 = vld [vmem:[%s1862_s10] ss:$0 sm:$0xff] }
 0x4af   :  { %1391 = vcosq.f32 %v1020_v25  ;;  %v1116_v26 = vand.u32 2147483647, %v1115_v21 }
 0x4b0   :  { %1393 = vsinq.f32 %v1020_v25 }
 0x4b1   :  { %v1119_v28 = vmul.f32 %v1118_v42, %v1116_v26 }
 0x4b3   :  { %v1120_v31 = vxor.u32 2147483648, %v1119_v28 }
 0x4b5   :  { %v1121_v35 = vsel %vm1038_vm14, %v1120_v31, %v1119_v28 }
 0x4b6   :  { %v1124_v10 = vsel %vm1037_vm8, %v1768_v6, %v1121_v35 }
 0x4b7   :  { %1395 = vcosq.f32 %v1124_v10 }
 0x4b8   :  { %1397 = vsinq.f32 %v1124_v10 }
 0x4b9   :  { %v1392_v12 = vpop.eup %1391 }
 0x4ba   :  { %v1394_v43 = vpop.eup %1393  ;;  %v1032_v44 = vxor.u32 2147483648, %v1392_v12 }
 0x4bb   :  { %v1029_v29 = vxor.u32 2147483648, %v1394_v43 }
 0x4bc   :  { %v1033_v46 = vsel %vm1031_vm9, %v1032_v44, %v1394_v43 }
 0x4bd   :  { %v1030_v48 = vsel %vm1028_vm10, %v1392_v12, %v1029_v29 }
 0x4be   :  { %v1034_v51 = vsel %vm1027_vm11, %v1030_v48, %v1033_v46 }
 0x4bf   :  { %v1035_v33 = vsel %vm1024_vm1, nan, %v1034_v51 }
 0x4c1   :  { %v1396_v37 = vpop.eup %1395 }
 0x4c2   :  { %v1398_v55 = vpop.eup %1397  ;;  %v1136_v57 = vxor.u32 2147483648, %v1396_v37 }
 0x4c3   :  { %v1133_v59 = vxor.u32 2147483648, %v1398_v55 }
 0x4c4   :  { %v1137_v0 = vsel %vm1135_vm12, %v1136_v57, %v1398_v55 }
 0x4c5   :  { %v1134_v60 = vsel %vm1132_vm13, %v1396_v37, %v1133_v59 }
 0x4c6   :  { %v1138_v45 = vsel %vm1131_vm15, %v1134_v60, %v1137_v0 }
 0x4c7   :  { %v1139_v11 = vsel %vm1128_vm0, nan, %v1138_v45 }
 0x4c8   :  { %v1140_v56 = vpack.c.bf16 %v1139_v11, %v1035_v33 }
 0x4ca   :  { %1316 = vmatmul.mubr.msk.bf16.vlgmr.msra.gmra.mrb[8].mxu0 %vm1156_vm2, %v1140_v56 }
 0x59d   :  { %v1194_v50 = vpop.f32.mrb[8].mxu0 }
 0x59e   :  { %v1195_v61 = vadd.f32 %v1263_v62, %v1194_v50  ;;  %v1317_v30 = vpop.f32.mrb[9].mxu0 }
 0x59f   :  { %v1197_v52 = vpop.f32.mrb[10].mxu0 }
 0x5a0   :  { %v1268_v2 = vpack.c.bf16 %v1195_v61, %v1195_v61  ;;  %v1198_v4 = vadd.f32 %v1263_v62, %v1197_v52  ;;  %v1318_v7 = vpop.f32.mrb[11].mxu0 }
 0x5a2   :  { %1210 = vst.msk [vmem:[%s1863_s11] sm:$0xf] %vm1209_vm3, %v1268_v2  ;;  %v1269_v6 = vpack.c.bf16 %v1198_v4, %v1198_v4 }
 0x5a4   :  { %1211 = vst.msk [vmem:[%s1863_s11 + $0x4] sm:$0xf] %vm1209_vm3, %v1269_v6 }

</bundles_post_ra>
